<compile_context>
chip_gen: v7x
topology: tpu7x:2x2x1
jax: 0.10.0
libtpu: 0.0.40
codegen_flags: <defaults>
</compile_context>

<pallas_src>
import functools

import jax
import jax.numpy as jnp
from jax.experimental import pallas as pl
from jax.experimental.pallas import tpu as pltpu


def _tmem_kernel(q_ref, wih_ref, whh_ref, b_ref, key_ref, valp_ref, valin_ref,
                 out_ref, loss_ref, *, seq_len, batch):
    """q_ref:(S*Bp,D) bf16, wih/whh:(D,4D) bf16, b:(1,4D) f32,
    key_ref:(D,M) f32 (pre-normalized columns of the memory key),
    valp_ref:(M,S) f32, valin_ref:(Bp,S,Dv) f32 -> out:(Bp,Dv), loss:(1,1) SMEM."""
    S = seq_len
    SB, D = q_ref.shape
    B = SB // S                                   # padded (sublane-aligned) batch
    M = key_ref.shape[1]
    margin = jnp.float32(1.0)
    eps = jnp.float32(1e-12)

    # ---- non-recurrent input projection: one MXU call over all S*B rows ----
    x_proj = jnp.dot(q_ref[...], wih_ref[...],
                     preferred_element_type=jnp.float32)      # (S*B, 4D) f32

    # ---- loop-invariant loads hoisted out of the recurrence ----
    whh = whh_ref[...]                                         # (D, 4D) bf16
    bias = b_ref[...]                                          # (1, 4D) f32

    # ---- single-layer LSTM, fully unrolled (PyTorch gate order i, f, g, o) ----
    h = jnp.zeros((B, D), jnp.float32)
    c = jnp.zeros((B, D), jnp.float32)
    for s in range(S):                                         # S static -> unrolled
        gates = (x_proj[s * B:(s + 1) * B, :]
                 + jnp.dot(h.astype(jnp.bfloat16), whh,
                           preferred_element_type=jnp.float32)
                 + bias)                                       # (B, 4D) f32
        i = jax.nn.sigmoid(gates[:, 0:D])
        f = jax.nn.sigmoid(gates[:, D:2 * D])
        g = jnp.tanh(gates[:, 2 * D:3 * D])
        o = jax.nn.sigmoid(gates[:, 3 * D:4 * D])
        c = f * c + i * g
        h = o * jnp.tanh(c)                                    # output[-1] carry

    # ---- F.normalize(query_lstm, dim=1) via rsqrt (EUP slot) ----
    q_norm = h * jax.lax.rsqrt(
        jnp.maximum(jnp.sum(h * h, axis=1, keepdims=True), eps * eps))

    # ---- similarity against pre-normalized key -> (B, M), softmax over M ----
    sim = jnp.dot(q_norm, key_ref[...], preferred_element_type=jnp.float32)
    e = jnp.exp(sim - jnp.max(sim, axis=1, keepdims=True))
    r_att = e * pl.reciprocal(jnp.sum(e, axis=1, keepdims=True), approx=True)

    # ---- read = softmax(r_att @ val_param, dim=1) -> (B, S) ----
    rl = jnp.dot(r_att, valp_ref[...], preferred_element_type=jnp.float32)
    er = jnp.exp(rl - jnp.max(rl, axis=1, keepdims=True))
    read = er * pl.reciprocal(jnp.sum(er, axis=1, keepdims=True), approx=True)

    # ---- out = bmm(read.unsqueeze(1), val).squeeze(1) -> (B, Dv) ----
    out = jnp.sum(read[:, :, None] * valin_ref[...], axis=1)
    out_ref[...] = out.astype(out_ref.dtype)

    # ---- loss: topk over batch; topk[-1]-topk[0] == min - max per mem slot ----
    # Mask out padded batch rows so they cannot perturb the min/max.
    rows = jax.lax.broadcasted_iota(jnp.int32, (B, M), 0)
    valid = rows < batch
    big = jnp.float32(3.0e38)
    r_min = jnp.min(jnp.where(valid, r_att, big), axis=0, keepdims=True)
    r_max = jnp.max(jnp.where(valid, r_att, -big), axis=0, keepdims=True)
    dist = jnp.maximum(r_min - r_max + margin, 0.0)            # (1, M)
    loss_ref[0, 0] = jnp.sum(dist) * jnp.float32(1.0 / M)


def temporal_memory_forward(query, val, params, seq_len):
    """query: (B*S, D) f32, val: (B*S, Dv) f32."""
    S = seq_len
    BS, D = query.shape
    B = BS // S
    Dv = val.shape[1]
    M = params["key"].shape[0]
    B_pad = max(8, ((B + 7) // 8) * 8)             # fill f32 sublane groups

    # seq-major query, padded batch, bf16 MXU operand
    q = query.reshape(B, S, D).transpose(1, 0, 2)              # (S, B, D)
    q = jnp.pad(q, ((0, 0), (0, B_pad - B), (0, 0)))
    q_flat = q.reshape(S * B_pad, D).astype(jnp.bfloat16)      # (S*Bp, D)

    v = val.reshape(B, S, Dv).astype(jnp.float32)
    v = jnp.pad(v, ((0, B_pad - B), (0, 0), (0, 0)))           # (Bp, S, Dv)

    wih_t = params["w_ih"].T.astype(jnp.bfloat16)              # (D, 4D)
    whh_t = params["w_hh"].T.astype(jnp.bfloat16)              # (D, 4D)
    bias = (params["b_ih"] + params["b_hh"]).reshape(1, 4 * D).astype(jnp.float32)

    # Key normalization is parameter-only -> do it once outside the kernel.
    # F.normalize(key.t(), dim=1) == normalize each key column over the mem axis.
    key = params["key"].astype(jnp.float32)                    # (M, D)
    col_norm = jnp.maximum(
        jnp.sqrt(jnp.sum(key * key, axis=0, keepdims=True)), 1e-12)
    key_dm = (key / col_norm).T                                # (D, M)
    valp = params["val"].astype(jnp.float32)                   # (M, S)

    flops = (2 * S * B_pad * D * 4 * D) * 2 + 2 * B_pad * D * M \
            + 2 * B_pad * M * S + 2 * B_pad * S * Dv
    transcendentals = S * B_pad * 4 * D + B_pad * (M + S)
    bytes_accessed = (q_flat.size * 2 + wih_t.size * 2 + whh_t.size * 2
                      + bias.size * 4 + key_dm.size * 4 + valp.size * 4
                      + v.size * 4 + B_pad * Dv * 4 + 4)

    vmem = pl.BlockSpec(memory_space=pltpu.MemorySpace.VMEM)
    smem = pl.BlockSpec(memory_space=pltpu.MemorySpace.SMEM)
    out, loss = pl.pallas_call(
        functools.partial(_tmem_kernel, seq_len=S, batch=B),
        out_shape=(jax.ShapeDtypeStruct((B_pad, Dv), jnp.float32),
                   jax.ShapeDtypeStruct((1, 1), jnp.float32)),
        in_specs=[vmem] * 7,
        out_specs=(vmem, smem),
        compiler_params=pltpu.CompilerParams(
            vmem_limit_bytes=32 * 1024 * 1024),
        cost_estimate=pl.CostEstimate(flops=flops,
                                      transcendentals=transcendentals,
                                      bytes_accessed=bytes_accessed),
    )(q_flat, wih_t, whh_t, bias, key_dm, valp, v)
    return {"out": out[:B], "loss": {"mem_trip": loss[0, 0]}}


def temporal_memory_reference(query, val, params, seq_len):
    """Pure-JAX f32 reference mirroring the PyTorch forward."""
    S = seq_len
    BS, D = query.shape
    B = BS // S
    Dv = val.shape[1]
    q = query.reshape(B, S, D).transpose(1, 0, 2)
    wih, whh = params["w_ih"], params["w_hh"]
    b = params["b_ih"] + params["b_hh"]
    h = jnp.zeros((B, D), jnp.float32)
    c = jnp.zeros((B, D), jnp.float32)
    for s in range(S):
        gates = q[s] @ wih.T + h @ whh.T + b
        i = jax.nn.sigmoid(gates[:, 0:D])
        f = jax.nn.sigmoid(gates[:, D:2 * D])
        g = jnp.tanh(gates[:, 2 * D:3 * D])
        o = jax.nn.sigmoid(gates[:, 3 * D:4 * D])
        c = f * c + i * g
        h = o * jnp.tanh(c)
    qn = h / jnp.maximum(jnp.linalg.norm(h, axis=1, keepdims=True), 1e-12)
    kt = params["key"].T
    ktn = kt / jnp.maximum(jnp.linalg.norm(kt, axis=1, keepdims=True), 1e-12)
    sim = qn @ ktn
    r_att = jax.nn.softmax(sim, axis=1)
    read = jax.nn.softmax(r_att @ params["val"], axis=1)
    v = val.reshape(B, S, Dv)
    out = jnp.einsum("bs,bsd->bd", read, v)
    dist = jnp.min(r_att, axis=0) - jnp.max(r_att, axis=0) + 1.0
    mem_trip = jnp.mean(jnp.maximum(dist, 0.0))
    return {"out": out, "loss": {"mem_trip": mem_trip}}


if __name__ == "__main__":
    # Small, TPU-friendly shapes consistent with the module's forward.
    feat_dim = 128     # feat_dim (2048 in the original)
    mem_size = 16      # mem_size (100 in the original)
    seq_len = 8        # S (6 in the original)
    batch = 4          # B  -> query has B*S rows
    val_dim = 128      # feature dim of the `val` argument

    root = jax.random.PRNGKey(0)
    kq, kv, kk, kvp, k1, k2, k3, k4 = jax.random.split(root, 8)

    bound = 1.0 / (feat_dim ** 0.5)
    params = {
        "key":  jax.random.normal(kk, (mem_size, feat_dim), jnp.float32),
        "val":  jax.random.uniform(kvp, (mem_size, seq_len), jnp.float32),
        "w_ih": jax.random.uniform(k1, (4 * feat_dim, feat_dim), jnp.float32,
                                   -bound, bound),
        "w_hh": jax.random.uniform(k2, (4 * feat_dim, feat_dim), jnp.float32,
                                   -bound, bound),
        "b_ih": jax.random.uniform(k3, (4 * feat_dim,), jnp.float32, -bound, bound),
        "b_hh": jax.random.uniform(k4, (4 * feat_dim,), jnp.float32, -bound, bound),
    }

    query = jax.random.normal(kq, (batch * seq_len, feat_dim), jnp.float32)
    val = jax.random.normal(kv, (batch * seq_len, val_dim), jnp.float32)

    result = temporal_memory_forward(query, val, params, seq_len)
    jax.block_until_ready(result)

    ref = temporal_memory_reference(query, val, params, seq_len)
    # bf16 MXU operands + approx EUP reciprocals -> slightly looser tolerances.
    assert jnp.allclose(result["out"], ref["out"], rtol=2e-2, atol=2e-2)
    assert jnp.allclose(result["loss"]["mem_trip"], ref["loss"]["mem_trip"],
                        rtol=1e-2, atol=1e-2)

    print("KERNEL_OK")
</pallas_src>

<mosaic_0001>
module attributes {stable_mosaic.version = 11 : i64} {
  func.func @_tmem_kernel(%arg0: memref<64x128xbf16, #tpu.memory_space<vmem>>, %arg1: memref<128x512xbf16, #tpu.memory_space<vmem>>, %arg2: memref<128x512xbf16, #tpu.memory_space<vmem>>, %arg3: memref<1x512xf32, #tpu.memory_space<vmem>>, %arg4: memref<128x16xf32, #tpu.memory_space<vmem>>, %arg5: memref<16x8xf32, #tpu.memory_space<vmem>>, %arg6: memref<8x8x128xf32, #tpu.memory_space<vmem>>, %arg7: memref<8x128xf32, #tpu.memory_space<vmem>>, %arg8: memref<1x1xf32, #tpu.memory_space<smem>>) attributes {dimension_semantics = [], scalar_prefetch = 0 : i64, scratch_operands = 0 : i64, tpu.core_type = #tpu.core_type<tc>} {
    %c0 = arith.constant 0 : index
    %c0_0 = arith.constant 0 : index
    %0 = vector.load %arg0[%c0, %c0_0] : memref<64x128xbf16, #tpu.memory_space<vmem>>, vector<64x128xbf16>
    %c0_1 = arith.constant 0 : index
    %c0_2 = arith.constant 0 : index
    %1 = vector.load %arg1[%c0_1, %c0_2] : memref<128x512xbf16, #tpu.memory_space<vmem>>, vector<128x512xbf16>
    %cst = arith.constant dense<0.000000e+00> : vector<64x512xf32>
    %2 = tpu.matmul %0, %1, %cst {dimension_numbers = #tpu.dot_dimension_numbers<[1], [0], [0], [1], [0, 0, 1, 1], [], []>} : vector<64x128xbf16>, vector<128x512xbf16>, vector<64x512xf32> -> vector<64x512xf32>
    %c0_3 = arith.constant 0 : index
    %c0_4 = arith.constant 0 : index
    %3 = vector.load %arg2[%c0_3, %c0_4] : memref<128x512xbf16, #tpu.memory_space<vmem>>, vector<128x512xbf16>
    %c0_5 = arith.constant 0 : index
    %c0_6 = arith.constant 0 : index
    %4 = vector.load %arg3[%c0_5, %c0_6] : memref<1x512xf32, #tpu.memory_space<vmem>>, vector<1x512xf32>
    %cst_7 = arith.constant 0.000000e+00 : f32
    %5 = vector.broadcast %cst_7 : f32 to vector<8x128xf32>
    %cst_8 = arith.constant 0.000000e+00 : f32
    %6 = vector.broadcast %cst_8 : f32 to vector<8x128xf32>
    %7 = vector.extract_strided_slice %2 {offsets = [0, 0], sizes = [8, 512], strides = [1, 1]} : vector<64x512xf32> to vector<8x512xf32>
    %8 = arith.truncf %5 : vector<8x128xf32> to vector<8x128xbf16>
    %cst_9 = arith.constant dense<0.000000e+00> : vector<8x512xf32>
    %9 = tpu.matmul %8, %3, %cst_9 {dimension_numbers = #tpu.dot_dimension_numbers<[1], [0], [0], [1], [0, 0, 1, 1], [], []>} : vector<8x128xbf16>, vector<128x512xbf16>, vector<8x512xf32> -> vector<8x512xf32>
    %10 = arith.addf %7, %9 : vector<8x512xf32>
    %11 = vector.broadcast %4 : vector<1x512xf32> to vector<8x512xf32>
    %12 = arith.addf %10, %11 : vector<8x512xf32>
    %13 = vector.extract_strided_slice %12 {offsets = [0, 0], sizes = [8, 128], strides = [1, 1]} : vector<8x512xf32> to vector<8x128xf32>
    %14 = arith.negf %13 : vector<8x128xf32>
    %15 = math.exp %14 : vector<8x128xf32>
    %cst_10 = arith.constant 1.000000e+00 : f32
    %16 = vector.broadcast %cst_10 : f32 to vector<8x128xf32>
    %17 = arith.addf %16, %15 : vector<8x128xf32>
    %18 = arith.divf %16, %17 : vector<8x128xf32>
    %19 = vector.extract_strided_slice %12 {offsets = [0, 128], sizes = [8, 128], strides = [1, 1]} : vector<8x512xf32> to vector<8x128xf32>
    %20 = arith.negf %19 : vector<8x128xf32>
    %21 = math.exp %20 : vector<8x128xf32>
    %cst_11 = arith.constant 1.000000e+00 : f32
    %22 = vector.broadcast %cst_11 : f32 to vector<8x128xf32>
    %23 = arith.addf %22, %21 : vector<8x128xf32>
    %24 = arith.divf %22, %23 : vector<8x128xf32>
    %25 = vector.extract_strided_slice %12 {offsets = [0, 256], sizes = [8, 128], strides = [1, 1]} : vector<8x512xf32> to vector<8x128xf32>
    %26 = math.tanh %25 : vector<8x128xf32>
    %27 = vector.extract_strided_slice %12 {offsets = [0, 384], sizes = [8, 128], strides = [1, 1]} : vector<8x512xf32> to vector<8x128xf32>
    %28 = arith.negf %27 : vector<8x128xf32>
    %29 = math.exp %28 : vector<8x128xf32>
    %cst_12 = arith.constant 1.000000e+00 : f32
    %30 = vector.broadcast %cst_12 : f32 to vector<8x128xf32>
    %31 = arith.addf %30, %29 : vector<8x128xf32>
    %32 = arith.divf %30, %31 : vector<8x128xf32>
    %33 = arith.mulf %24, %6 : vector<8x128xf32>
    %34 = arith.mulf %18, %26 : vector<8x128xf32>
    %35 = arith.addf %33, %34 : vector<8x128xf32>
    %36 = math.tanh %35 : vector<8x128xf32>
    %37 = arith.mulf %32, %36 : vector<8x128xf32>
    %38 = vector.extract_strided_slice %2 {offsets = [8, 0], sizes = [8, 512], strides = [1, 1]} : vector<64x512xf32> to vector<8x512xf32>
    %39 = arith.truncf %37 : vector<8x128xf32> to vector<8x128xbf16>
    %cst_13 = arith.constant dense<0.000000e+00> : vector<8x512xf32>
    %40 = tpu.matmul %39, %3, %cst_13 {dimension_numbers = #tpu.dot_dimension_numbers<[1], [0], [0], [1], [0, 0, 1, 1], [], []>} : vector<8x128xbf16>, vector<128x512xbf16>, vector<8x512xf32> -> vector<8x512xf32>
    %41 = arith.addf %38, %40 : vector<8x512xf32>
    %42 = vector.broadcast %4 : vector<1x512xf32> to vector<8x512xf32>
    %43 = arith.addf %41, %42 : vector<8x512xf32>
    %44 = vector.extract_strided_slice %43 {offsets = [0, 0], sizes = [8, 128], strides = [1, 1]} : vector<8x512xf32> to vector<8x128xf32>
    %45 = arith.negf %44 : vector<8x128xf32>
    %46 = math.exp %45 : vector<8x128xf32>
    %cst_14 = arith.constant 1.000000e+00 : f32
    %47 = vector.broadcast %cst_14 : f32 to vector<8x128xf32>
    %48 = arith.addf %47, %46 : vector<8x128xf32>
    %49 = arith.divf %47, %48 : vector<8x128xf32>
    %50 = vector.extract_strided_slice %43 {offsets = [0, 128], sizes = [8, 128], strides = [1, 1]} : vector<8x512xf32> to vector<8x128xf32>
    %51 = arith.negf %50 : vector<8x128xf32>
    %52 = math.exp %51 : vector<8x128xf32>
    %cst_15 = arith.constant 1.000000e+00 : f32
    %53 = vector.broadcast %cst_15 : f32 to vector<8x128xf32>
    %54 = arith.addf %53, %52 : vector<8x128xf32>
    %55 = arith.divf %53, %54 : vector<8x128xf32>
    %56 = vector.extract_strided_slice %43 {offsets = [0, 256], sizes = [8, 128], strides = [1, 1]} : vector<8x512xf32> to vector<8x128xf32>
    %57 = math.tanh %56 : vector<8x128xf32>
    %58 = vector.extract_strided_slice %43 {offsets = [0, 384], sizes = [8, 128], strides = [1, 1]} : vector<8x512xf32> to vector<8x128xf32>
    %59 = arith.negf %58 : vector<8x128xf32>
    %60 = math.exp %59 : vector<8x128xf32>
    %cst_16 = arith.constant 1.000000e+00 : f32
    %61 = vector.broadcast %cst_16 : f32 to vector<8x128xf32>
    %62 = arith.addf %61, %60 : vector<8x128xf32>
    %63 = arith.divf %61, %62 : vector<8x128xf32>
    %64 = arith.mulf %55, %35 : vector<8x128xf32>
    %65 = arith.mulf %49, %57 : vector<8x128xf32>
    %66 = arith.addf %64, %65 : vector<8x128xf32>
    %67 = math.tanh %66 : vector<8x128xf32>
    %68 = arith.mulf %63, %67 : vector<8x128xf32>
    %69 = vector.extract_strided_slice %2 {offsets = [16, 0], sizes = [8, 512], strides = [1, 1]} : vector<64x512xf32> to vector<8x512xf32>
    %70 = arith.truncf %68 : vector<8x128xf32> to vector<8x128xbf16>
    %cst_17 = arith.constant dense<0.000000e+00> : vector<8x512xf32>
    %71 = tpu.matmul %70, %3, %cst_17 {dimension_numbers = #tpu.dot_dimension_numbers<[1], [0], [0], [1], [0, 0, 1, 1], [], []>} : vector<8x128xbf16>, vector<128x512xbf16>, vector<8x512xf32> -> vector<8x512xf32>
    %72 = arith.addf %69, %71 : vector<8x512xf32>
    %73 = vector.broadcast %4 : vector<1x512xf32> to vector<8x512xf32>
    %74 = arith.addf %72, %73 : vector<8x512xf32>
    %75 = vector.extract_strided_slice %74 {offsets = [0, 0], sizes = [8, 128], strides = [1, 1]} : vector<8x512xf32> to vector<8x128xf32>
    %76 = arith.negf %75 : vector<8x128xf32>
    %77 = math.exp %76 : vector<8x128xf32>
    %cst_18 = arith.constant 1.000000e+00 : f32
    %78 = vector.broadcast %cst_18 : f32 to vector<8x128xf32>
    %79 = arith.addf %78, %77 : vector<8x128xf32>
    %80 = arith.divf %78, %79 : vector<8x128xf32>
    %81 = vector.extract_strided_slice %74 {offsets = [0, 128], sizes = [8, 128], strides = [1, 1]} : vector<8x512xf32> to vector<8x128xf32>
    %82 = arith.negf %81 : vector<8x128xf32>
    %83 = math.exp %82 : vector<8x128xf32>
    %cst_19 = arith.constant 1.000000e+00 : f32
    %84 = vector.broadcast %cst_19 : f32 to vector<8x128xf32>
    %85 = arith.addf %84, %83 : vector<8x128xf32>
    %86 = arith.divf %84, %85 : vector<8x128xf32>
    %87 = vector.extract_strided_slice %74 {offsets = [0, 256], sizes = [8, 128], strides = [1, 1]} : vector<8x512xf32> to vector<8x128xf32>
    %88 = math.tanh %87 : vector<8x128xf32>
    %89 = vector.extract_strided_slice %74 {offsets = [0, 384], sizes = [8, 128], strides = [1, 1]} : vector<8x512xf32> to vector<8x128xf32>
    %90 = arith.negf %89 : vector<8x128xf32>
    %91 = math.exp %90 : vector<8x128xf32>
    %cst_20 = arith.constant 1.000000e+00 : f32
    %92 = vector.broadcast %cst_20 : f32 to vector<8x128xf32>
    %93 = arith.addf %92, %91 : vector<8x128xf32>
    %94 = arith.divf %92, %93 : vector<8x128xf32>
    %95 = arith.mulf %86, %66 : vector<8x128xf32>
    %96 = arith.mulf %80, %88 : vector<8x128xf32>
    %97 = arith.addf %95, %96 : vector<8x128xf32>
    %98 = math.tanh %97 : vector<8x128xf32>
    %99 = arith.mulf %94, %98 : vector<8x128xf32>
    %100 = vector.extract_strided_slice %2 {offsets = [24, 0], sizes = [8, 512], strides = [1, 1]} : vector<64x512xf32> to vector<8x512xf32>
    %101 = arith.truncf %99 : vector<8x128xf32> to vector<8x128xbf16>
    %cst_21 = arith.constant dense<0.000000e+00> : vector<8x512xf32>
    %102 = tpu.matmul %101, %3, %cst_21 {dimension_numbers = #tpu.dot_dimension_numbers<[1], [0], [0], [1], [0, 0, 1, 1], [], []>} : vector<8x128xbf16>, vector<128x512xbf16>, vector<8x512xf32> -> vector<8x512xf32>
    %103 = arith.addf %100, %102 : vector<8x512xf32>
    %104 = vector.broadcast %4 : vector<1x512xf32> to vector<8x512xf32>
    %105 = arith.addf %103, %104 : vector<8x512xf32>
    %106 = vector.extract_strided_slice %105 {offsets = [0, 0], sizes = [8, 128], strides = [1, 1]} : vector<8x512xf32> to vector<8x128xf32>
    %107 = arith.negf %106 : vector<8x128xf32>
    %108 = math.exp %107 : vector<8x128xf32>
    %cst_22 = arith.constant 1.000000e+00 : f32
    %109 = vector.broadcast %cst_22 : f32 to vector<8x128xf32>
    %110 = arith.addf %109, %108 : vector<8x128xf32>
    %111 = arith.divf %109, %110 : vector<8x128xf32>
    %112 = vector.extract_strided_slice %105 {offsets = [0, 128], sizes = [8, 128], strides = [1, 1]} : vector<8x512xf32> to vector<8x128xf32>
    %113 = arith.negf %112 : vector<8x128xf32>
    %114 = math.exp %113 : vector<8x128xf32>
    %cst_23 = arith.constant 1.000000e+00 : f32
    %115 = vector.broadcast %cst_23 : f32 to vector<8x128xf32>
    %116 = arith.addf %115, %114 : vector<8x128xf32>
    %117 = arith.divf %115, %116 : vector<8x128xf32>
    %118 = vector.extract_strided_slice %105 {offsets = [0, 256], sizes = [8, 128], strides = [1, 1]} : vector<8x512xf32> to vector<8x128xf32>
    %119 = math.tanh %118 : vector<8x128xf32>
    %120 = vector.extract_strided_slice %105 {offsets = [0, 384], sizes = [8, 128], strides = [1, 1]} : vector<8x512xf32> to vector<8x128xf32>
    %121 = arith.negf %120 : vector<8x128xf32>
    %122 = math.exp %121 : vector<8x128xf32>
    %cst_24 = arith.constant 1.000000e+00 : f32
    %123 = vector.broadcast %cst_24 : f32 to vector<8x128xf32>
    %124 = arith.addf %123, %122 : vector<8x128xf32>
    %125 = arith.divf %123, %124 : vector<8x128xf32>
    %126 = arith.mulf %117, %97 : vector<8x128xf32>
    %127 = arith.mulf %111, %119 : vector<8x128xf32>
    %128 = arith.addf %126, %127 : vector<8x128xf32>
    %129 = math.tanh %128 : vector<8x128xf32>
    %130 = arith.mulf %125, %129 : vector<8x128xf32>
    %131 = vector.extract_strided_slice %2 {offsets = [32, 0], sizes = [8, 512], strides = [1, 1]} : vector<64x512xf32> to vector<8x512xf32>
    %132 = arith.truncf %130 : vector<8x128xf32> to vector<8x128xbf16>
    %cst_25 = arith.constant dense<0.000000e+00> : vector<8x512xf32>
    %133 = tpu.matmul %132, %3, %cst_25 {dimension_numbers = #tpu.dot_dimension_numbers<[1], [0], [0], [1], [0, 0, 1, 1], [], []>} : vector<8x128xbf16>, vector<128x512xbf16>, vector<8x512xf32> -> vector<8x512xf32>
    %134 = arith.addf %131, %133 : vector<8x512xf32>
    %135 = vector.broadcast %4 : vector<1x512xf32> to vector<8x512xf32>
    %136 = arith.addf %134, %135 : vector<8x512xf32>
    %137 = vector.extract_strided_slice %136 {offsets = [0, 0], sizes = [8, 128], strides = [1, 1]} : vector<8x512xf32> to vector<8x128xf32>
    %138 = arith.negf %137 : vector<8x128xf32>
    %139 = math.exp %138 : vector<8x128xf32>
    %cst_26 = arith.constant 1.000000e+00 : f32
    %140 = vector.broadcast %cst_26 : f32 to vector<8x128xf32>
    %141 = arith.addf %140, %139 : vector<8x128xf32>
    %142 = arith.divf %140, %141 : vector<8x128xf32>
    %143 = vector.extract_strided_slice %136 {offsets = [0, 128], sizes = [8, 128], strides = [1, 1]} : vector<8x512xf32> to vector<8x128xf32>
    %144 = arith.negf %143 : vector<8x128xf32>
    %145 = math.exp %144 : vector<8x128xf32>
    %cst_27 = arith.constant 1.000000e+00 : f32
    %146 = vector.broadcast %cst_27 : f32 to vector<8x128xf32>
    %147 = arith.addf %146, %145 : vector<8x128xf32>
    %148 = arith.divf %146, %147 : vector<8x128xf32>
    %149 = vector.extract_strided_slice %136 {offsets = [0, 256], sizes = [8, 128], strides = [1, 1]} : vector<8x512xf32> to vector<8x128xf32>
    %150 = math.tanh %149 : vector<8x128xf32>
    %151 = vector.extract_strided_slice %136 {offsets = [0, 384], sizes = [8, 128], strides = [1, 1]} : vector<8x512xf32> to vector<8x128xf32>
    %152 = arith.negf %151 : vector<8x128xf32>
    %153 = math.exp %152 : vector<8x128xf32>
    %cst_28 = arith.constant 1.000000e+00 : f32
    %154 = vector.broadcast %cst_28 : f32 to vector<8x128xf32>
    %155 = arith.addf %154, %153 : vector<8x128xf32>
    %156 = arith.divf %154, %155 : vector<8x128xf32>
    %157 = arith.mulf %148, %128 : vector<8x128xf32>
    %158 = arith.mulf %142, %150 : vector<8x128xf32>
    %159 = arith.addf %157, %158 : vector<8x128xf32>
    %160 = math.tanh %159 : vector<8x128xf32>
    %161 = arith.mulf %156, %160 : vector<8x128xf32>
    %162 = vector.extract_strided_slice %2 {offsets = [40, 0], sizes = [8, 512], strides = [1, 1]} : vector<64x512xf32> to vector<8x512xf32>
    %163 = arith.truncf %161 : vector<8x128xf32> to vector<8x128xbf16>
    %cst_29 = arith.constant dense<0.000000e+00> : vector<8x512xf32>
    %164 = tpu.matmul %163, %3, %cst_29 {dimension_numbers = #tpu.dot_dimension_numbers<[1], [0], [0], [1], [0, 0, 1, 1], [], []>} : vector<8x128xbf16>, vector<128x512xbf16>, vector<8x512xf32> -> vector<8x512xf32>
    %165 = arith.addf %162, %164 : vector<8x512xf32>
    %166 = vector.broadcast %4 : vector<1x512xf32> to vector<8x512xf32>
    %167 = arith.addf %165, %166 : vector<8x512xf32>
    %168 = vector.extract_strided_slice %167 {offsets = [0, 0], sizes = [8, 128], strides = [1, 1]} : vector<8x512xf32> to vector<8x128xf32>
    %169 = arith.negf %168 : vector<8x128xf32>
    %170 = math.exp %169 : vector<8x128xf32>
    %cst_30 = arith.constant 1.000000e+00 : f32
    %171 = vector.broadcast %cst_30 : f32 to vector<8x128xf32>
    %172 = arith.addf %171, %170 : vector<8x128xf32>
    %173 = arith.divf %171, %172 : vector<8x128xf32>
    %174 = vector.extract_strided_slice %167 {offsets = [0, 128], sizes = [8, 128], strides = [1, 1]} : vector<8x512xf32> to vector<8x128xf32>
    %175 = arith.negf %174 : vector<8x128xf32>
    %176 = math.exp %175 : vector<8x128xf32>
    %cst_31 = arith.constant 1.000000e+00 : f32
    %177 = vector.broadcast %cst_31 : f32 to vector<8x128xf32>
    %178 = arith.addf %177, %176 : vector<8x128xf32>
    %179 = arith.divf %177, %178 : vector<8x128xf32>
    %180 = vector.extract_strided_slice %167 {offsets = [0, 256], sizes = [8, 128], strides = [1, 1]} : vector<8x512xf32> to vector<8x128xf32>
    %181 = math.tanh %180 : vector<8x128xf32>
    %182 = vector.extract_strided_slice %167 {offsets = [0, 384], sizes = [8, 128], strides = [1, 1]} : vector<8x512xf32> to vector<8x128xf32>
    %183 = arith.negf %182 : vector<8x128xf32>
    %184 = math.exp %183 : vector<8x128xf32>
    %cst_32 = arith.constant 1.000000e+00 : f32
    %185 = vector.broadcast %cst_32 : f32 to vector<8x128xf32>
    %186 = arith.addf %185, %184 : vector<8x128xf32>
    %187 = arith.divf %185, %186 : vector<8x128xf32>
    %188 = arith.mulf %179, %159 : vector<8x128xf32>
    %189 = arith.mulf %173, %181 : vector<8x128xf32>
    %190 = arith.addf %188, %189 : vector<8x128xf32>
    %191 = math.tanh %190 : vector<8x128xf32>
    %192 = arith.mulf %187, %191 : vector<8x128xf32>
    %193 = vector.extract_strided_slice %2 {offsets = [48, 0], sizes = [8, 512], strides = [1, 1]} : vector<64x512xf32> to vector<8x512xf32>
    %194 = arith.truncf %192 : vector<8x128xf32> to vector<8x128xbf16>
    %cst_33 = arith.constant dense<0.000000e+00> : vector<8x512xf32>
    %195 = tpu.matmul %194, %3, %cst_33 {dimension_numbers = #tpu.dot_dimension_numbers<[1], [0], [0], [1], [0, 0, 1, 1], [], []>} : vector<8x128xbf16>, vector<128x512xbf16>, vector<8x512xf32> -> vector<8x512xf32>
    %196 = arith.addf %193, %195 : vector<8x512xf32>
    %197 = vector.broadcast %4 : vector<1x512xf32> to vector<8x512xf32>
    %198 = arith.addf %196, %197 : vector<8x512xf32>
    %199 = vector.extract_strided_slice %198 {offsets = [0, 0], sizes = [8, 128], strides = [1, 1]} : vector<8x512xf32> to vector<8x128xf32>
    %200 = arith.negf %199 : vector<8x128xf32>
    %201 = math.exp %200 : vector<8x128xf32>
    %cst_34 = arith.constant 1.000000e+00 : f32
    %202 = vector.broadcast %cst_34 : f32 to vector<8x128xf32>
    %203 = arith.addf %202, %201 : vector<8x128xf32>
    %204 = arith.divf %202, %203 : vector<8x128xf32>
    %205 = vector.extract_strided_slice %198 {offsets = [0, 128], sizes = [8, 128], strides = [1, 1]} : vector<8x512xf32> to vector<8x128xf32>
    %206 = arith.negf %205 : vector<8x128xf32>
    %207 = math.exp %206 : vector<8x128xf32>
    %cst_35 = arith.constant 1.000000e+00 : f32
    %208 = vector.broadcast %cst_35 : f32 to vector<8x128xf32>
    %209 = arith.addf %208, %207 : vector<8x128xf32>
    %210 = arith.divf %208, %209 : vector<8x128xf32>
    %211 = vector.extract_strided_slice %198 {offsets = [0, 256], sizes = [8, 128], strides = [1, 1]} : vector<8x512xf32> to vector<8x128xf32>
    %212 = math.tanh %211 : vector<8x128xf32>
    %213 = vector.extract_strided_slice %198 {offsets = [0, 384], sizes = [8, 128], strides = [1, 1]} : vector<8x512xf32> to vector<8x128xf32>
    %214 = arith.negf %213 : vector<8x128xf32>
    %215 = math.exp %214 : vector<8x128xf32>
    %cst_36 = arith.constant 1.000000e+00 : f32
    %216 = vector.broadcast %cst_36 : f32 to vector<8x128xf32>
    %217 = arith.addf %216, %215 : vector<8x128xf32>
    %218 = arith.divf %216, %217 : vector<8x128xf32>
    %219 = arith.mulf %210, %190 : vector<8x128xf32>
    %220 = arith.mulf %204, %212 : vector<8x128xf32>
    %221 = arith.addf %219, %220 : vector<8x128xf32>
    %222 = math.tanh %221 : vector<8x128xf32>
    %223 = arith.mulf %218, %222 : vector<8x128xf32>
    %224 = vector.extract_strided_slice %2 {offsets = [56, 0], sizes = [8, 512], strides = [1, 1]} : vector<64x512xf32> to vector<8x512xf32>
    %225 = arith.truncf %223 : vector<8x128xf32> to vector<8x128xbf16>
    %cst_37 = arith.constant dense<0.000000e+00> : vector<8x512xf32>
    %226 = tpu.matmul %225, %3, %cst_37 {dimension_numbers = #tpu.dot_dimension_numbers<[1], [0], [0], [1], [0, 0, 1, 1], [], []>} : vector<8x128xbf16>, vector<128x512xbf16>, vector<8x512xf32> -> vector<8x512xf32>
    %227 = arith.addf %224, %226 : vector<8x512xf32>
    %228 = vector.broadcast %4 : vector<1x512xf32> to vector<8x512xf32>
    %229 = arith.addf %227, %228 : vector<8x512xf32>
    %230 = vector.extract_strided_slice %229 {offsets = [0, 0], sizes = [8, 128], strides = [1, 1]} : vector<8x512xf32> to vector<8x128xf32>
    %231 = arith.negf %230 : vector<8x128xf32>
    %232 = math.exp %231 : vector<8x128xf32>
    %cst_38 = arith.constant 1.000000e+00 : f32
    %233 = vector.broadcast %cst_38 : f32 to vector<8x128xf32>
    %234 = arith.addf %233, %232 : vector<8x128xf32>
    %235 = arith.divf %233, %234 : vector<8x128xf32>
    %236 = vector.extract_strided_slice %229 {offsets = [0, 128], sizes = [8, 128], strides = [1, 1]} : vector<8x512xf32> to vector<8x128xf32>
    %237 = arith.negf %236 : vector<8x128xf32>
    %238 = math.exp %237 : vector<8x128xf32>
    %cst_39 = arith.constant 1.000000e+00 : f32
    %239 = vector.broadcast %cst_39 : f32 to vector<8x128xf32>
    %240 = arith.addf %239, %238 : vector<8x128xf32>
    %241 = arith.divf %239, %240 : vector<8x128xf32>
    %242 = vector.extract_strided_slice %229 {offsets = [0, 256], sizes = [8, 128], strides = [1, 1]} : vector<8x512xf32> to vector<8x128xf32>
    %243 = math.tanh %242 : vector<8x128xf32>
    %244 = vector.extract_strided_slice %229 {offsets = [0, 384], sizes = [8, 128], strides = [1, 1]} : vector<8x512xf32> to vector<8x128xf32>
    %245 = arith.negf %244 : vector<8x128xf32>
    %246 = math.exp %245 : vector<8x128xf32>
    %cst_40 = arith.constant 1.000000e+00 : f32
    %247 = vector.broadcast %cst_40 : f32 to vector<8x128xf32>
    %248 = arith.addf %247, %246 : vector<8x128xf32>
    %249 = arith.divf %247, %248 : vector<8x128xf32>
    %250 = arith.mulf %241, %221 : vector<8x128xf32>
    %251 = arith.mulf %235, %243 : vector<8x128xf32>
    %252 = arith.addf %250, %251 : vector<8x128xf32>
    %253 = math.tanh %252 : vector<8x128xf32>
    %254 = arith.mulf %249, %253 : vector<8x128xf32>
    %255 = arith.mulf %254, %254 : vector<8x128xf32>
    %cst_41 = arith.constant dense<0.000000e+00> : vector<8xf32>
    %256 = vector.multi_reduction <add>, %255, %cst_41 [1] : vector<8x128xf32> to vector<8xf32>
    %257 = vector.shape_cast %256 : vector<8xf32> to vector<8x1xf32>
    %cst_42 = arith.constant 9.99999996E-13 : f32
    %cst_43 = arith.constant 9.99999996E-13 : f32
    %258 = arith.mulf %cst_42, %cst_43 : f32
    %259 = vector.broadcast %258 : f32 to vector<8x1xf32>
    %260 = arith.maximumf %257, %259 : vector<8x1xf32>
    %261 = math.rsqrt %260 : vector<8x1xf32>
    %262 = vector.broadcast %261 : vector<8x1xf32> to vector<8x128xf32>
    %263 = arith.mulf %254, %262 : vector<8x128xf32>
    %c0_44 = arith.constant 0 : index
    %c0_45 = arith.constant 0 : index
    %264 = vector.load %arg4[%c0_44, %c0_45] : memref<128x16xf32, #tpu.memory_space<vmem>>, vector<128x16xf32>
    %cst_46 = arith.constant dense<0.000000e+00> : vector<8x16xf32>
    %265 = tpu.matmul %263, %264, %cst_46 {dimension_numbers = #tpu.dot_dimension_numbers<[1], [0], [0], [1], [0, 0, 1, 1], [], []>} : vector<8x128xf32>, vector<128x16xf32>, vector<8x16xf32> -> vector<8x16xf32>
    %cst_47 = arith.constant dense<0xFF800000> : vector<8xf32>
    %266 = vector.multi_reduction <maximumf>, %265, %cst_47 [1] : vector<8x16xf32> to vector<8xf32>
    %267 = vector.shape_cast %266 : vector<8xf32> to vector<8x1xf32>
    %268 = vector.broadcast %267 : vector<8x1xf32> to vector<8x16xf32>
    %269 = arith.subf %265, %268 : vector<8x16xf32>
    %270 = math.exp %269 : vector<8x16xf32>
    %cst_48 = arith.constant dense<0.000000e+00> : vector<8xf32>
    %271 = vector.multi_reduction <add>, %270, %cst_48 [1] : vector<8x16xf32> to vector<8xf32>
    %272 = vector.shape_cast %271 : vector<8xf32> to vector<8x1xf32>
    %273 = tpu.reciprocal %272 {approx = true} : vector<8x1xf32> -> vector<8x1xf32>
    %274 = vector.broadcast %273 : vector<8x1xf32> to vector<8x16xf32>
    %275 = arith.mulf %270, %274 : vector<8x16xf32>
    %c0_49 = arith.constant 0 : index
    %c0_50 = arith.constant 0 : index
    %276 = vector.load %arg5[%c0_49, %c0_50] : memref<16x8xf32, #tpu.memory_space<vmem>>, vector<16x8xf32>
    %cst_51 = arith.constant dense<0.000000e+00> : vector<8x8xf32>
    %277 = tpu.matmul %275, %276, %cst_51 {dimension_numbers = #tpu.dot_dimension_numbers<[1], [0], [0], [1], [0, 0, 1, 1], [], []>} : vector<8x16xf32>, vector<16x8xf32>, vector<8x8xf32> -> vector<8x8xf32>
    %cst_52 = arith.constant dense<0xFF800000> : vector<8xf32>
    %278 = vector.multi_reduction <maximumf>, %277, %cst_52 [1] : vector<8x8xf32> to vector<8xf32>
    %279 = vector.shape_cast %278 : vector<8xf32> to vector<8x1xf32>
    %280 = vector.broadcast %279 : vector<8x1xf32> to vector<8x8xf32>
    %281 = arith.subf %277, %280 : vector<8x8xf32>
    %282 = math.exp %281 : vector<8x8xf32>
    %cst_53 = arith.constant dense<0.000000e+00> : vector<8xf32>
    %283 = vector.multi_reduction <add>, %282, %cst_53 [1] : vector<8x8xf32> to vector<8xf32>
    %284 = vector.shape_cast %283 : vector<8xf32> to vector<8x1xf32>
    %285 = tpu.reciprocal %284 {approx = true} : vector<8x1xf32> -> vector<8x1xf32>
    %286 = vector.broadcast %285 : vector<8x1xf32> to vector<8x8xf32>
    %287 = arith.mulf %282, %286 : vector<8x8xf32>
    %288 = vector.shape_cast %287 : vector<8x8xf32> to vector<8x8x1xf32>
    %c0_54 = arith.constant 0 : index
    %c0_55 = arith.constant 0 : index
    %c0_56 = arith.constant 0 : index
    %289 = vector.load %arg6[%c0_54, %c0_55, %c0_56] : memref<8x8x128xf32, #tpu.memory_space<vmem>>, vector<8x8x128xf32>
    %290 = vector.broadcast %288 : vector<8x8x1xf32> to vector<8x8x128xf32>
    %291 = arith.mulf %290, %289 : vector<8x8x128xf32>
    %cst_57 = arith.constant dense<0.000000e+00> : vector<8x128xf32>
    %292 = vector.multi_reduction <add>, %291, %cst_57 [1] : vector<8x8x128xf32> to vector<8x128xf32>
    %c0_58 = arith.constant 0 : index
    %c0_59 = arith.constant 0 : index
    %293 = vector.load %arg7[%c0_58, %c0_59] : memref<8x128xf32, #tpu.memory_space<vmem>>, vector<8x128xf32>
    tpu.vector_store %arg7[%c0_58, %c0_59], %292 {strides = array<i32>} : memref<8x128xf32, #tpu.memory_space<vmem>>, vector<8x128xf32>,
    %294 = tpu.iota {dimensions = array<i32: 0>} : vector<8x16xi32>
    %c4_i32 = arith.constant 4 : i32
    %295 = vector.broadcast %c4_i32 : i32 to vector<8x16xi32>
    %296 = arith.cmpi slt, %294, %295 : vector<8x16xi32>
    %cst_60 = arith.constant 3.000000e+38 : f32
    %297 = vector.broadcast %cst_60 : f32 to vector<8x16xf32>
    %298 = arith.select %296, %275, %297 : vector<8x16xi1>, vector<8x16xf32>
    %cst_61 = arith.constant dense<0x7F800000> : vector<16xf32>
    %299 = vector.multi_reduction <minimumf>, %298, %cst_61 [0] : vector<8x16xf32> to vector<16xf32>
    %300 = vector.shape_cast %299 : vector<16xf32> to vector<1x16xf32>
    %cst_62 = arith.constant 0.000000e+00 : f32
    %cst_63 = arith.constant 3.000000e+38 : f32
    %301 = arith.subf %cst_62, %cst_63 : f32
    %302 = vector.broadcast %301 : f32 to vector<8x16xf32>
    %303 = arith.select %296, %275, %302 : vector<8x16xi1>, vector<8x16xf32>
    %cst_64 = arith.constant dense<0xFF800000> : vector<16xf32>
    %304 = vector.multi_reduction <maximumf>, %303, %cst_64 [0] : vector<8x16xf32> to vector<16xf32>
    %305 = vector.shape_cast %304 : vector<16xf32> to vector<1x16xf32>
    %306 = arith.subf %300, %305 : vector<1x16xf32>
    %cst_65 = arith.constant 1.000000e+00 : f32
    %307 = vector.broadcast %cst_65 : f32 to vector<1x16xf32>
    %308 = arith.addf %306, %307 : vector<1x16xf32>
    %cst_66 = arith.constant 0.000000e+00 : f32
    %309 = vector.broadcast %cst_66 : f32 to vector<1x16xf32>
    %310 = arith.maximumf %308, %309 : vector<1x16xf32>
    %311 = vector.shape_cast %310 : vector<1x16xf32> to vector<1x1x16xf32>
    %cst_67 = arith.constant dense<0.000000e+00> : vector<1xf32>
    %312 = vector.multi_reduction <add>, %311, %cst_67 [1, 2] : vector<1x1x16xf32> to vector<1xf32>
    %313 = vector.shape_cast %312 : vector<1xf32> to vector<1x1x1xf32>
    %314 = vector.extract %313[0, 0, 0] : f32 from vector<1x1x1xf32>
    %cst_68 = arith.constant 6.250000e-02 : f32
    %315 = arith.mulf %314, %cst_68 : f32
    %c0_69 = arith.constant 0 : index
    %c0_70 = arith.constant 0 : index
    %316 = memref.load %arg8[%c0_69, %c0_70] : memref<1x1xf32, #tpu.memory_space<smem>>
    memref.store %315, %arg8[%c0_69, %c0_70] : memref<1x1xf32, #tpu.memory_space<smem>>
    return
  }
}

</mosaic_0001>

<bundles_post_ra>
// kernel: tpu_custom_call.1
= control target key start
LH: loop header
LB: loop body
LE: loop exit
PB: predicated region body
PF: predicated region fallthrough
CT: control target
= control target key end

     0   :  { %14 = vsyncpa [#allocation3], 0  ;;  %s3260_s0 = inlined_call_operand.vmem [shape: bf16[64,128], index: 0, kind: input, shape index: {}]   ;;  %s3261_s1 = inlined_call_operand.hbm [shape: bf16[128,512], index: 1, kind: input, shape index: {}]   ;;  %s3262_s2 = inlined_call_operand.hbm [shape: bf16[128,512], index: 2, kind: input, shape index: {}]   ;;  %s3263_s3 = inlined_call_operand.vmem [shape: f32[1,512], index: 3, kind: input, shape index: {}]   ;;  %s3264_s4 = inlined_call_operand.vmem [shape: f32[128,16], index: 4, kind: input, shape index: {}]   ;;  %s3265_s5 = inlined_call_operand.vmem [shape: f32[16,8], index: 5, kind: input, shape index: {}]   ;;  %s3266_s6 = inlined_call_operand.vmem [shape: f32[8,8,128], index: 6, kind: input, shape index: {}]   ;;  %s3267_s7 = inlined_call_operand.hbm [shape: f32[8,128], index: 7, kind: output, shape index: {0}]   ;;  %s3268_s8 = inlined_call_operand.hbm [shape: f32[1,1], index: 8, kind: output, shape index: {1}]  }
   0x1   :  { %15 = vsyncpa [#allocation7], 0 }
   0x2   :  { %16 = vsyncpa [#allocation4], 0 }
   0x3   :  { %17 = vsyncpa [#allocation5], 0  ;;  %s2510_s27 = smov [#allocation2]   ;;  %s2426_s9 = scalar_lea.hbm %s3261_s1, 4096 }
   0x4   :  { %s25_s28 = sshll.u32 %s2510_s27, 4  ;;  %p2427_p0 = scmp.ne.s32.totalorder %s3261_s1, %s2426_s9  ;;  %s26_s28 = int_to_ptr.vmem [resolvable:$true] %s25_s28 }
   0x5   :  { %p2430_p1 = scmp.lt.u32.totalorder %s2426_s9, %s3261_s1 }
   0x7   :  { %p2432_p2 = pnand %p2430_p1, %p2427_p0 }
   0x9   :  { %2435 = shalt.err (!%p2432_p2)
}
   0xa   :  { %s2436_s14 = scalar_lea.vmem %s26_s28, 4096  ;;  %p2441_p4 = scmp.lt.s32.totalorder %s26_s28, %s26_s28 }
   0xb   :  { %p2437_p3 = scmp.ne.s32.totalorder %s26_s28, %s2436_s14  ;;  %p2442_p5 = scmp.lt.s32.totalorder %s2436_s14, %s2436_s14 }
   0xd   :  { %p2443_p6 = por %p2442_p5, %p2441_p4 }
   0xf   :  { %p2444_p7 = pnand %p2443_p6, %p2437_p3 }
  0x11   :  { %2447 = shalt.err (!%p2444_p7)
}
  0x12   :  { %s2511_s15 = smov 256   ;;  %s2512_s16 = smov 16  }
  0x13   :  { %31 = dma.hbm_to_vmem [thread:$0]  %s3261_s1, 4096, %s26_s28, [#allocation3], %s2511_s15, %s2511_s15, %s2512_s16  }
  0x14   :  { %s2513_s19 = smov [#allocation6]   ;;  %s2448_s23 = scalar_lea.hbm %s3262_s2, 4096 }
  0x15   :  { %s37_s20 = sshll.u32 %s2513_s19, 4  ;;  %p2449_p8 = scmp.ne.s32.totalorder %s3262_s2, %s2448_s23  ;;  %s38_s20 = int_to_ptr.vmem [resolvable:$true] %s37_s20 }
  0x16   :  { %p2452_p9 = scmp.lt.u32.totalorder %s2448_s23, %s3262_s2 }
  0x18   :  { %p2454_p10 = pnand %p2452_p9, %p2449_p8 }
  0x1a   :  { %2457 = shalt.err (!%p2454_p10)
}
  0x1b   :  { %s2458_s29 = scalar_lea.vmem %s38_s20, 4096  ;;  %p2463_p12 = scmp.lt.s32.totalorder %s38_s20, %s38_s20 }
  0x1c   :  { %p2459_p11 = scmp.ne.s32.totalorder %s38_s20, %s2458_s29  ;;  %p2464_p13 = scmp.lt.s32.totalorder %s2458_s29, %s2458_s29 }
  0x1e   :  { %p2465_p0 = por %p2464_p13, %p2463_p12 }
  0x20   :  { %p2466_p1 = pnand %p2465_p0, %p2459_p11 }
  0x22   :  { %2469 = shalt.err (!%p2466_p1)
}
  0x23   :  { %43 = dma.hbm_to_vmem [thread:$0]  %s3262_s2, 4096, %s38_s20, [#allocation7], %s2511_s15, %s2511_s15, %s2512_s16  }
  0x24   :  { %2502 = dma.done.wait [#allocation3], 4096  }
  0x25   :  { %2503 = vsyncadd [#allocation3], 4294963200 }
  0x26   :  { %2504 = dma.done.wait [#allocation7], 4096  }
  0x27   :  { %2505 = vsyncadd [#allocation7], 4294963200  ;;  %v3269_v0 = vmov 0   ;;  %v2156_v1 = vld [vmem:[#allocation2 + $0x4] ss:$16 sps:$4 sm:$0xff]   ;;  %v2217_v44 = vld [vmem:[%s3260_s0 + $0x8] sm:$0xff]  }
  0x28   :  { %315 = vmatprep.mubr.bf16.mxu0 %v3269_v0  ;;  %388 = vmatprep.mubr.bf16.mxu1 %v3269_v0  ;;  %v2158_v2 = vld [vmem:[#allocation2 + $0xc] ss:$16 sps:$4 sm:$0xff]   ;;  %v2160_v3 = vld [vmem:[#allocation2] ss:$16 sps:$4 sm:$0xff]   ;;  %v2161_v4 = vld [vmem:[#allocation2 + $0x8] ss:$16 sps:$4 sm:$0xff]  }
  0x29   :  { %283 = vmatprep.subr.bf16.mxu0 %v2156_v1  ;;  %356 = vmatprep.subr.bf16.mxu1 %v2158_v2  ;;  %v2162_v5 = vld [vmem:[#allocation2 + $0x24] ss:$16 sps:$4 sm:$0xff]   ;;  %v2164_v6 = vld [vmem:[#allocation2 + $0x2c] ss:$16 sps:$4 sm:$0xff]   ;;  %v2166_v7 = vld [vmem:[#allocation2 + $0x20] ss:$16 sps:$4 sm:$0xff]  }
  0x2a   :  { %284 = vmatpush1.bf16.msra.mxu0 %v2160_v3  ;;  %357 = vmatpush1.bf16.msra.mxu1 %v2161_v4  ;;  %v2167_v8 = vld [vmem:[#allocation2 + $0x28] ss:$16 sps:$4 sm:$0xff]   ;;  %v2168_v9 = vld [vmem:[#allocation2 + $0x44] ss:$16 sps:$4 sm:$0xff]   ;;  %v2170_v10 = vld [vmem:[#allocation2 + $0x4c] ss:$16 sps:$4 sm:$0xff]  }
  0x2b   :  { %285 = vmatprep.subr.bf16.mxu0 %v2162_v5  ;;  %358 = vmatprep.subr.bf16.mxu1 %v2164_v6  ;;  %v2172_v11 = vld [vmem:[#allocation2 + $0x40] ss:$16 sps:$4 sm:$0xff]   ;;  %v2173_v12 = vld [vmem:[#allocation2 + $0x48] ss:$16 sps:$4 sm:$0xff]   ;;  %v2174_v13 = vld [vmem:[#allocation2 + $0x64] ss:$16 sps:$4 sm:$0xff]  }
  0x2c   :  { %v2176_v14 = vld [vmem:[#allocation2 + $0x6c] ss:$16 sps:$4 sm:$0xff]   ;;  %v2178_v15 = vld [vmem:[#allocation2 + $0x60] ss:$16 sps:$4 sm:$0xff]   ;;  %v2179_v16 = vld [vmem:[#allocation2 + $0x68] ss:$16 sps:$4 sm:$0xff]  }
  0x2d   :  { %v2180_v17 = vld [vmem:[#allocation2 + $0x84] ss:$16 sps:$4 sm:$0xff]   ;;  %v2182_v18 = vld [vmem:[#allocation2 + $0x8c] ss:$16 sps:$4 sm:$0xff]   ;;  %v2184_v19 = vld [vmem:[#allocation2 + $0x80] ss:$16 sps:$4 sm:$0xff]  }
  0x2e   :  { %286 = vmatpush1.bf16.msra.mxu0 %v2166_v7  ;;  %359 = vmatpush1.bf16.msra.mxu1 %v2167_v8  ;;  %v2185_v20 = vld [vmem:[#allocation2 + $0x88] ss:$16 sps:$4 sm:$0xff]   ;;  %v2186_v21 = vld [vmem:[#allocation2 + $0xa4] ss:$16 sps:$4 sm:$0xff]   ;;  %v2188_v22 = vld [vmem:[#allocation2 + $0xac] ss:$16 sps:$4 sm:$0xff]  }
  0x2f   :  { %287 = vmatprep.subr.bf16.mxu0 %v2168_v9  ;;  %360 = vmatprep.subr.bf16.mxu1 %v2170_v10  ;;  %v2190_v23 = vld [vmem:[#allocation2 + $0xa0] ss:$16 sps:$4 sm:$0xff]   ;;  %v2191_v24 = vld [vmem:[#allocation2 + $0xa8] ss:$16 sps:$4 sm:$0xff]   ;;  %v2192_v25 = vld [vmem:[#allocation2 + $0xc4] ss:$16 sps:$4 sm:$0xff]  }
  0x30   :  { %v2194_v26 = vld [vmem:[#allocation2 + $0xcc] ss:$16 sps:$4 sm:$0xff]   ;;  %v2196_v27 = vld [vmem:[#allocation2 + $0xc0] ss:$16 sps:$4 sm:$0xff]   ;;  %v2197_v28 = vld [vmem:[#allocation2 + $0xc8] ss:$16 sps:$4 sm:$0xff]  }
  0x31   :  { %v2198_v29 = vld [vmem:[#allocation2 + $0xe4] ss:$16 sps:$4 sm:$0xff]   ;;  %v2200_v30 = vld [vmem:[#allocation2 + $0xec] ss:$16 sps:$4 sm:$0xff]   ;;  %v2202_v31 = vld [vmem:[#allocation2 + $0xe0] ss:$16 sps:$4 sm:$0xff]  }
  0x32   :  { %288 = vmatpush1.bf16.msra.mxu0 %v2172_v11  ;;  %361 = vmatpush1.bf16.msra.mxu1 %v2173_v12  ;;  %v2203_v32 = vld [vmem:[#allocation2 + $0xe8] ss:$16 sps:$4 sm:$0xff]   ;;  %v2591_v33 = vld [vmem:[#allocation6 + $0x4] ss:$16 sps:$4 sm:$0xff]   ;;  %v2593_v34 = vld [vmem:[#allocation6 + $0xc] ss:$16 sps:$4 sm:$0xff]  }
  0x33   :  { %289 = vmatprep.subr.bf16.mxu0 %v2174_v13  ;;  %362 = vmatprep.subr.bf16.mxu1 %v2176_v14  ;;  %v2204_v35 = vld [vmem:[%s3260_s0] sm:$0xff]   ;;  %v2600_v37 = vld [vmem:[#allocation6 + $0x8] ss:$16 sps:$4 sm:$0xff]   ;;  %v2606_v39 = vld [vmem:[#allocation6 + $0x2c] ss:$16 sps:$4 sm:$0xff]   ;;  %vm2516_vm0 = vmmov 0  }
  0x34   :  { %v2598_v36 = vld [vmem:[#allocation6] ss:$16 sps:$4 sm:$0xff]   ;;  %v2604_v38 = vld [vmem:[#allocation6 + $0x24] ss:$16 sps:$4 sm:$0xff]   ;;  %v2612_v41 = vld [vmem:[#allocation6 + $0x28] ss:$16 sps:$4 sm:$0xff]  }
  0x35   :  { %v2608_v40 = vld [vmem:[#allocation6 + $0x20] ss:$16 sps:$4 sm:$0xff]   ;;  %v2616_v42 = vld [vmem:[#allocation6 + $0x44] ss:$16 sps:$4 sm:$0xff]   ;;  %v2618_v43 = vld [vmem:[#allocation6 + $0x4c] ss:$16 sps:$4 sm:$0xff]  }
  0x36   :  { %290 = vmatpush1.bf16.msra.mxu0 %v2178_v15  ;;  %363 = vmatpush1.bf16.msra.mxu1 %v2179_v16  ;;  %v2625_v45 = vld [vmem:[#allocation6 + $0x40] ss:$16 sps:$4 sm:$0xff]   ;;  %v2627_v46 = vld [vmem:[#allocation6 + $0x48] ss:$16 sps:$4 sm:$0xff]   ;;  %v2631_v47 = vld [vmem:[#allocation6 + $0x64] ss:$16 sps:$4 sm:$0xff]  }
  0x37   :  { %291 = vmatprep.subr.bf16.mxu0 %v2180_v17  ;;  %364 = vmatprep.subr.bf16.mxu1 %v2182_v18  ;;  %v2635_v48 = vld [vmem:[#allocation6 + $0x6c] ss:$16 sps:$4 sm:$0xff]   ;;  %v2637_v49 = vld [vmem:[#allocation6 + $0x60] ss:$16 sps:$4 sm:$0xff]   ;;  %v2639_v50 = vld [vmem:[#allocation6 + $0x68] ss:$16 sps:$4 sm:$0xff]  }
  0x38   :  { %v2643_v51 = vld [vmem:[#allocation6 + $0x84] ss:$16 sps:$4 sm:$0xff]   ;;  %v2647_v52 = vld [vmem:[#allocation6 + $0x8c] ss:$16 sps:$4 sm:$0xff]   ;;  %v2656_v54 = vld [vmem:[#allocation6 + $0x80] ss:$16 sps:$4 sm:$0xff]  }
  0x39   :  { %v2230_v53 = vld [vmem:[%s3260_s0 + $0x10] sm:$0xff]   ;;  %v2658_v55 = vld [vmem:[#allocation6 + $0x88] ss:$16 sps:$4 sm:$0xff]   ;;  %v2664_v57 = vld [vmem:[#allocation6 + $0xac] ss:$16 sps:$4 sm:$0xff]   ;;  %vm1654_vm1 = vcmask 130048  }
  0x3a   :  { %292 = vmatpush1.bf16.msra.mxu0 %v2184_v19  ;;  %365 = vmatpush1.bf16.msra.mxu1 %v2185_v20  ;;  %v2662_v56 = vld [vmem:[#allocation6 + $0xa4] ss:$16 sps:$4 sm:$0xff]   ;;  %v2668_v58 = vld [vmem:[#allocation6 + $0xa0] ss:$16 sps:$4 sm:$0xff]   ;;  %v2670_v59 = vld [vmem:[#allocation6 + $0xa8] ss:$16 sps:$4 sm:$0xff]  }
  0x3b   :  { %293 = vmatprep.subr.bf16.mxu0 %v2186_v21  ;;  %366 = vmatprep.subr.bf16.mxu1 %v2188_v22  ;;  %v2674_v60 = vld [vmem:[#allocation6 + $0xc4] ss:$16 sps:$4 sm:$0xff]   ;;  %v2676_v61 = vld [vmem:[#allocation6 + $0xcc] ss:$16 sps:$4 sm:$0xff]   ;;  %v2685_v63 = vld [vmem:[#allocation6 + $0xc0] ss:$16 sps:$4 sm:$0xff]  }
  0x3c   :  { %v2243_v62 = vld [vmem:[%s3260_s0 + $0x18] sm:$0xff]   ;;  %v2691_v2 = vld [vmem:[#allocation6 + $0xe4] ss:$16 sps:$4 sm:$0xff]   ;;  %v2697_v4 = vld [vmem:[#allocation6 + $0xe0] ss:$16 sps:$4 sm:$0xff]   ;;  %vm1741_vm3 = vcmask 64512  }
  0x3d   :  { %v2687_v1 = vld [vmem:[#allocation6 + $0xc8] ss:$16 sps:$4 sm:$0xff]   ;;  %v2693_v3 = vld [vmem:[#allocation6 + $0xec] ss:$16 sps:$4 sm:$0xff]   ;;  %vm1919_vm4 = vcmask 122880   ;;  %s2470_s27 = scalar_lea.hbm %s3268_s8, 16 }
  0x3e   :  { %294 = vmatpush1.bf16.msra.mxu0 %v2190_v23  ;;  %367 = vmatpush1.bf16.msra.mxu1 %v2191_v24  ;;  %v2699_v5 = vld [vmem:[#allocation6 + $0xe8] ss:$16 sps:$4 sm:$0xff]   ;;  %p2471_p2 = scmp.ne.s32.totalorder %s3268_s8, %s2470_s27  ;;  %p2474_p3 = scmp.lt.u32.totalorder %s2470_s27, %s3268_s8 }
  0x3f   :  { %295 = vmatprep.subr.bf16.mxu0 %v2192_v25  ;;  %368 = vmatprep.subr.bf16.mxu1 %v2194_v26 }
  0x40   :  { %p2476_p4 = pnand %p2474_p3, %p2471_p2 }
  0x42   :  { %296 = vmatpush1.bf16.msra.mxu0 %v2196_v27  ;;  %369 = vmatpush1.bf16.msra.mxu1 %v2197_v28 }
  0x43   :  { %297 = vmatprep.subr.bf16.mxu0 %v2198_v29  ;;  %370 = vmatprep.subr.bf16.mxu1 %v2200_v30  ;;  %v709_v30 = vlaneseq }
  0x46   :  { %298 = vmatpush1.bf16.msra.mxu0 %v2202_v31  ;;  %371 = vmatpush1.bf16.msra.mxu1 %v2203_v32  ;;  %v2785_v31 = vshrl.u32 %v709_v30, 7  ;;  %v461_v30 = vld [vmem:[%s3263_s3] sm:$0xf] }
  0x47   :  { %622 = vmatprep.subr.bf16.mxu0 %v2591_v33  ;;  %663 = vmatprep.subr.bf16.mxu1 %v2593_v34 }
  0x48   :  { %vm1899_vm2 = vcmp.lt.s32.totalorder %v2785_v31, 4 }
  0x49   :  { %316 = vmatmul.mubr.bf16.vlgmr.msra.gmra.mrb[0].mxu0 %v2204_v35  ;;  %389 = vmatmul.mubr.bf16.vlgmr.msra.gmra.mrb[0].mxu1 %v2204_v35 }
  0x4a   :  { %623 = vmatpush1.bf16.msra.mxu0 %v2598_v36  ;;  %664 = vmatpush1.bf16.msra.mxu1 %v2600_v37 }
  0x4b   :  { %624 = vmatprep.subr.bf16.mxu0 %v2604_v38  ;;  %665 = vmatprep.subr.bf16.mxu1 %v2606_v39 }
  0x4c   :  { %325 = vmatprep.mubr.bf16.mxu0 %v3269_v0  ;;  %398 = vmatprep.mubr.bf16.mxu1 %v3269_v0 }
  0x4e   :  { %625 = vmatpush1.bf16.msra.mxu0 %v2608_v40  ;;  %666 = vmatpush1.bf16.msra.mxu1 %v2612_v41 }
  0x4f   :  { %626 = vmatprep.subr.bf16.mxu0 %v2616_v42  ;;  %667 = vmatprep.subr.bf16.mxu1 %v2618_v43 }
  0x51   :  { %326 = vmatmul.mubr.bf16.gmra.mrb[4].mxu0 %v2217_v44  ;;  %399 = vmatmul.mubr.bf16.gmra.mrb[4].mxu1 %v2217_v44 }
  0x52   :  { %627 = vmatpush1.bf16.msra.mxu0 %v2625_v45  ;;  %668 = vmatpush1.bf16.msra.mxu1 %v2627_v46 }
  0x53   :  { %628 = vmatprep.subr.bf16.mxu0 %v2631_v47  ;;  %669 = vmatprep.subr.bf16.mxu1 %v2635_v48 }
  0x54   :  { %335 = vmatprep.mubr.bf16.mxu0 %v3269_v0  ;;  %408 = vmatprep.mubr.bf16.mxu1 %v3269_v0 }
  0x56   :  { %629 = vmatpush1.bf16.msra.mxu0 %v2637_v49  ;;  %670 = vmatpush1.bf16.msra.mxu1 %v2639_v50 }
  0x57   :  { %630 = vmatprep.subr.bf16.mxu0 %v2643_v51  ;;  %671 = vmatprep.subr.bf16.mxu1 %v2647_v52 }
  0x59   :  { %336 = vmatmul.mubr.bf16.gmra.mrb[8].mxu0 %v2230_v53  ;;  %409 = vmatmul.mubr.bf16.gmra.mrb[8].mxu1 %v2230_v53 }
  0x5a   :  { %631 = vmatpush1.bf16.msra.mxu0 %v2656_v54  ;;  %672 = vmatpush1.bf16.msra.mxu1 %v2658_v55 }
  0x5b   :  { %632 = vmatprep.subr.bf16.mxu0 %v2662_v56  ;;  %673 = vmatprep.subr.bf16.mxu1 %v2664_v57 }
  0x5c   :  { %345 = vmatprep.mubr.bf16.mxu0 %v3269_v0  ;;  %418 = vmatprep.mubr.bf16.mxu1 %v3269_v0 }
  0x5e   :  { %633 = vmatpush1.bf16.msra.mxu0 %v2668_v58  ;;  %674 = vmatpush1.bf16.msra.mxu1 %v2670_v59 }
  0x5f   :  { %634 = vmatprep.subr.bf16.mxu0 %v2674_v60  ;;  %675 = vmatprep.subr.bf16.mxu1 %v2676_v61 }
  0x61   :  { %346 = vmatmul.mubr.bf16.gmra.mrb[12].mxu0 %v2243_v62  ;;  %419 = vmatmul.mubr.bf16.gmra.mrb[12].mxu1 %v2243_v62 }
  0x62   :  { %635 = vmatpush1.bf16.msra.mxu0 %v2685_v63  ;;  %676 = vmatpush1.bf16.msra.mxu1 %v2687_v1 }
  0x63   :  { %636 = vmatprep.subr.bf16.mxu0 %v2691_v2  ;;  %677 = vmatprep.subr.bf16.mxu1 %v2693_v3 }
  0x64   :  { %654 = vmatprep.mubr.bf16.mxu0 %v3269_v0  ;;  %695 = vmatprep.mubr.bf16.mxu1 %v3269_v0 }
  0x66   :  { %637 = vmatpush1.bf16.msra.mxu0 %v2697_v4  ;;  %678 = vmatpush1.bf16.msra.mxu1 %v2699_v5 }
  0x67   :  { %758 = vmatprep.subr.bf16.mxu0 %v2591_v33  ;;  %799 = vmatprep.subr.bf16.mxu1 %v2593_v34 }
  0x69   :  { %655 = vmatmul.mubr.bf16.vlgmr.msra.gmra.mrb[16].mxu0 %v3269_v0  ;;  %696 = vmatmul.mubr.bf16.vlgmr.msra.gmra.mrb[16].mxu1 %v3269_v0 }
  0x6a   :  { %759 = vmatpush1.bf16.msra.mxu0 %v2598_v36  ;;  %800 = vmatpush1.bf16.msra.mxu1 %v2600_v37 }
  0x6b   :  { %760 = vmatprep.subr.bf16.mxu0 %v2604_v38  ;;  %801 = vmatprep.subr.bf16.mxu1 %v2606_v39 }
  0x6c   :  { %790 = vmatprep.mubr.bf16.mxu0 %v3269_v0  ;;  %831 = vmatprep.mubr.bf16.mxu1 %v3269_v0 }
  0x6e   :  { %761 = vmatpush1.bf16.msra.mxu0 %v2608_v40  ;;  %802 = vmatpush1.bf16.msra.mxu1 %v2612_v41 }
  0x6f   :  { %762 = vmatprep.subr.bf16.mxu0 %v2616_v42  ;;  %803 = vmatprep.subr.bf16.mxu1 %v2618_v43 }
  0x72   :  { %763 = vmatpush1.bf16.msra.mxu0 %v2625_v45  ;;  %804 = vmatpush1.bf16.msra.mxu1 %v2627_v46 }
  0x73   :  { %764 = vmatprep.subr.bf16.mxu0 %v2631_v47  ;;  %805 = vmatprep.subr.bf16.mxu1 %v2635_v48 }
  0x76   :  { %765 = vmatpush1.bf16.msra.mxu0 %v2637_v49  ;;  %806 = vmatpush1.bf16.msra.mxu1 %v2639_v50 }
  0x77   :  { %766 = vmatprep.subr.bf16.mxu0 %v2643_v51  ;;  %807 = vmatprep.subr.bf16.mxu1 %v2647_v52 }
  0x7a   :  { %767 = vmatpush1.bf16.msra.mxu0 %v2656_v54  ;;  %808 = vmatpush1.bf16.msra.mxu1 %v2658_v55 }
  0x7b   :  { %768 = vmatprep.subr.bf16.mxu0 %v2662_v56  ;;  %809 = vmatprep.subr.bf16.mxu1 %v2664_v57 }
  0x7e   :  { %769 = vmatpush1.bf16.msra.mxu0 %v2668_v58  ;;  %810 = vmatpush1.bf16.msra.mxu1 %v2670_v59 }
  0x7f   :  { %770 = vmatprep.subr.bf16.mxu0 %v2674_v60  ;;  %811 = vmatprep.subr.bf16.mxu1 %v2676_v61 }
  0x82   :  { %771 = vmatpush1.bf16.msra.mxu0 %v2685_v63  ;;  %812 = vmatpush1.bf16.msra.mxu1 %v2687_v1 }
  0x83   :  { %772 = vmatprep.subr.bf16.mxu0 %v2691_v2  ;;  %813 = vmatprep.subr.bf16.mxu1 %v2693_v3 }
  0x86   :  { %773 = vmatpush1.bf16.msra.mxu0 %v2697_v4  ;;  %814 = vmatpush1.bf16.msra.mxu1 %v2699_v5 }
  0x87   :  { %873 = vmatprep.subr.bf16.mxu0 %v2591_v33  ;;  %914 = vmatprep.subr.bf16.mxu1 %v2593_v34 }
 0x11c   :  { %v317_v6 = vpop.f32.mrb[0].mxu0  ;;  %v390_v7 = vpop.f32.mrb[0].mxu1 }
 0x11d   :  { %v319_v8 = vpop.f32.mrb[1].mxu0  ;;  %v392_v9 = vpop.f32.mrb[1].mxu1 }
 0x11e   :  { %v2745_v10 = vpop.f32.mrb[2].mxu0  ;;  %v2747_v11 = vpop.f32.mrb[2].mxu1 }
 0x11f   :  { %v2749_v12 = vpop.f32.mrb[3].mxu0  ;;  %v2751_v13 = vpop.f32.mrb[3].mxu1 }
 0x124   :  { %v2753_v14 = vpop.f32.mrb[4].mxu0  ;;  %v2755_v15 = vpop.f32.mrb[4].mxu1 }
 0x125   :  { %v2757_v16 = vpop.f32.mrb[5].mxu0  ;;  %v2759_v17 = vpop.f32.mrb[5].mxu1 }
 0x126   :  { %3272 = vst [vmem:[#allocation14_spill] sm:$0xff] %v2757_v16  ;;  %3273 = vst [vmem:[#allocation15_spill] sm:$0xff] %v2759_v17  ;;  %v2761_v18 = vpop.f32.mrb[6].mxu0  ;;  %v2763_v19 = vpop.f32.mrb[6].mxu1 }
 0x127   :  { %3274 = vst [vmem:[#allocation16_spill] sm:$0xff] %v2761_v18  ;;  %3275 = vst [vmem:[#allocation17_spill] sm:$0xff] %v2763_v19  ;;  %v2765_v20 = vpop.f32.mrb[7].mxu0  ;;  %v2767_v21 = vpop.f32.mrb[7].mxu1 }
 0x128   :  { %3276 = vst [vmem:[#allocation18_spill] sm:$0xff] %v2765_v20  ;;  %3277 = vst [vmem:[#allocation19_spill] sm:$0xff] %v2767_v21 }
 0x12c   :  { %v2769_v22 = vpop.f32.mrb[8].mxu0  ;;  %v2771_v23 = vpop.f32.mrb[8].mxu1 }
 0x12d   :  { %3278 = vst [vmem:[#allocation20_spill] sm:$0xff] %v2769_v22  ;;  %3279 = vst [vmem:[#allocation21_spill] sm:$0xff] %v2771_v23  ;;  %v2773_v24 = vpop.f32.mrb[9].mxu0  ;;  %v2775_v25 = vpop.f32.mrb[9].mxu1  ;;  %v723_v23 = vsub.s32 3, %v2785_v31 }
 0x12e   :  { %3280 = vst [vmem:[#allocation22_spill] sm:$0xff] %v2773_v24  ;;  %3281 = vst [vmem:[#allocation23_spill] sm:$0xff] %v2775_v25  ;;  %v2777_v26 = vpop.f32.mrb[10].mxu0  ;;  %v2779_v27 = vpop.f32.mrb[10].mxu1 }
 0x12f   :  { %3282 = vst [vmem:[#allocation24_spill] sm:$0xff] %v2777_v26  ;;  %3283 = vst [vmem:[#allocation25_spill] sm:$0xff] %v2779_v27  ;;  %v2781_v28 = vpop.f32.mrb[11].mxu0  ;;  %v2783_v29 = vpop.f32.mrb[11].mxu1 }
 0x130   :  { %3284 = vst [vmem:[#allocation26_spill] sm:$0xff] %v2781_v28  ;;  %3285 = vst [vmem:[#allocation27_spill] sm:$0xff] %v2783_v29  ;;  %v3271_v29 = vsub.s32 0, %v2785_v31 }
 0x134   :  { %v2787_v32 = vpop.f32.mrb[12].mxu0  ;;  %v2789_v35 = vpop.f32.mrb[12].mxu1 }
 0x135   :  { %3286 = vst [vmem:[#allocation28_spill] sm:$0xff] %v2787_v32  ;;  %3287 = vst [vmem:[#allocation29_spill] sm:$0xff] %v2789_v35  ;;  %v2791_v44 = vpop.f32.mrb[13].mxu0  ;;  %v2793_v53 = vpop.f32.mrb[13].mxu1  ;;  %v715_v35 = vsub.s32 1, %v2785_v31 }
 0x136   :  { %3288 = vst [vmem:[#allocation30_spill] sm:$0xff] %v2791_v44  ;;  %3289 = vst [vmem:[#allocation31_spill] sm:$0xff] %v2793_v53  ;;  %v2795_v62 = vpop.f32.mrb[14].mxu0  ;;  %v2797_v0 = vpop.f32.mrb[14].mxu1  ;;  %v2810_v44 = vrot.slane %v461_v30, %v3271_v29 }
 0x137   :  { %3290 = vst [vmem:[#allocation32_spill] sm:$0xff] %v2795_v62  ;;  %3291 = vst [vmem:[#allocation33_spill] sm:$0xff] %v2797_v0  ;;  %v2799_v27 = vpop.f32.mrb[15].mxu0  ;;  %v2801_v28 = vpop.f32.mrb[15].mxu1  ;;  %v2814_v0 = vrot.slane %v461_v30, %v715_v35 }
 0x138   :  { %3292 = vst [vmem:[#allocation34_spill] sm:$0xff] %v2799_v27  ;;  %3293 = vst [vmem:[#allocation35_spill] sm:$0xff] %v2801_v28 }
 0x13c   :  { %v656_v53 = vpop.f32.mrb[16].mxu0  ;;  %v697_v62 = vpop.f32.mrb[16].mxu1 }
 0x13d   :  { %v704_v27 = vadd.f32 %v656_v53, %v317_v6  ;;  %v706_v28 = vadd.f32 %v697_v62, %v390_v7  ;;  %v658_v32 = vpop.f32.mrb[17].mxu0  ;;  %v699_v26 = vpop.f32.mrb[17].mxu1  ;;  %v2821_v6 = vrot.slane %v461_v30, %v723_v23  ;;  %v719_v7 = vsub.s32 2, %v2785_v31 }
 0x13e   :  { %v705_v25 = vadd.f32 %v658_v32, %v319_v8  ;;  %v707_v24 = vadd.f32 %v699_v26, %v392_v9  ;;  %v660_v22 = vpop.f32.mrb[18].mxu0  ;;  %v701_v21 = vpop.f32.mrb[18].mxu1 }
 0x13f   :  { %v729_v20 = vadd.f32 %v2810_v44, %v704_v27  ;;  %v661_v29 = vpop.f32.mrb[19].mxu0  ;;  %v702_v19 = vpop.f32.mrb[19].mxu1  ;;  %v2827_v9 = vrot.slane %v461_v30, %v719_v7 }
 0x140   :  { %v730_v18 = vadd.f32 %v2814_v0, %v705_v25  ;;  %v732_v8 = vadd.f32 %v2821_v6, %v707_v24 }
 0x141   :  { %v2030_v17 = vmul.f32 -1.442695, %v729_v20  ;;  %v731_v19 = vadd.f32 %v2827_v9, %v706_v28 }
 0x142   :  { %v2031_v16 = vmul.f32 -1.442695, %v730_v18  ;;  %v2032_v21 = vmul.f32 -1.442695, %v732_v8 }
 0x143   :  { %2256 = vpow2.f32 %v2030_v17 }
 0x144   :  { %2258 = vpow2.f32 %v2031_v16 }
 0x145   :  { %2260 = vpow2.f32 %v2032_v21  ;;  %v3294_v21 = vmov 0  }
 0x146   :  { %2262 = vtanh.f32 %v731_v19 }
 0x14d   :  { %v2257_v22 = vpop.eup %2256 }
 0x14e   :  { %v2259_v20 = vpop.eup %2258  ;;  %v736_v18 = vadd.f32 1.0, %v2257_v22 }
 0x14f   :  { %v742_v25 = vadd.f32 1.0, %v2259_v20  ;;  %v2261_v17 = vpop.eup %2260 }
 0x150   :  { %2264 = vrcp.f32 %v736_v18  ;;  %v2263_v26 = vpop.eup %2262  ;;  %v749_v29 = vadd.f32 1.0, %v2261_v17 }
 0x151   :  { %2266 = vrcp.f32 %v742_v25 }
 0x152   :  { %2268 = vrcp.f32 %v749_v29 }
 0x15a   :  { %v2265_v16 = vpop.eup %2264 }
 0x15b   :  { %v2267_v27 = vpop.eup %2266  ;;  %v753_v24 = vmul.f32 %v2265_v16, %v2263_v26 }
 0x15c   :  { %v752_v32 = vmul.f32 0.0, %v2267_v27  ;;  %v2269_v28 = vpop.eup %2268 }
 0x15e   :  { %v2830_v53 = vadd.f32 %v753_v24, %v752_v32 }
 0x160   :  { %2270 = vtanh.f32 %v2830_v53 }
 0x16a   :  { %v2271_v62 = vpop.eup %2270 }
 0x16b   :  { %v756_v30 = vmul.f32 %v2271_v62, %v2269_v28 }
 0x16d   :  { %v757_v8 = vpack.c.bf16 %v756_v30, %v756_v30 }
 0x16f   :  { %791 = vmatmul.mubr.bf16.vlgmr.msra.gmra.mrb[20].mxu0 %v757_v8  ;;  %832 = vmatmul.mubr.bf16.vlgmr.msra.gmra.mrb[20].mxu1 %v757_v8 }
 0x170   :  { %874 = vmatpush1.bf16.msra.mxu0 %v2598_v36  ;;  %915 = vmatpush1.bf16.msra.mxu1 %v2600_v37 }
 0x171   :  { %875 = vmatprep.subr.bf16.mxu0 %v2604_v38  ;;  %916 = vmatprep.subr.bf16.mxu1 %v2606_v39 }
 0x172   :  { %905 = vmatprep.mubr.bf16.mxu0 %v3294_v21  ;;  %946 = vmatprep.mubr.bf16.mxu1 %v3294_v21 }
 0x174   :  { %876 = vmatpush1.bf16.msra.mxu0 %v2608_v40  ;;  %917 = vmatpush1.bf16.msra.mxu1 %v2612_v41 }
 0x175   :  { %877 = vmatprep.subr.bf16.mxu0 %v2616_v42  ;;  %918 = vmatprep.subr.bf16.mxu1 %v2618_v43 }
 0x178   :  { %878 = vmatpush1.bf16.msra.mxu0 %v2625_v45  ;;  %919 = vmatpush1.bf16.msra.mxu1 %v2627_v46 }
 0x179   :  { %879 = vmatprep.subr.bf16.mxu0 %v2631_v47  ;;  %920 = vmatprep.subr.bf16.mxu1 %v2635_v48 }
 0x17c   :  { %880 = vmatpush1.bf16.msra.mxu0 %v2637_v49  ;;  %921 = vmatpush1.bf16.msra.mxu1 %v2639_v50 }
 0x17d   :  { %881 = vmatprep.subr.bf16.mxu0 %v2643_v51  ;;  %922 = vmatprep.subr.bf16.mxu1 %v2647_v52 }
 0x180   :  { %882 = vmatpush1.bf16.msra.mxu0 %v2656_v54  ;;  %923 = vmatpush1.bf16.msra.mxu1 %v2658_v55 }
 0x181   :  { %883 = vmatprep.subr.bf16.mxu0 %v2662_v56  ;;  %924 = vmatprep.subr.bf16.mxu1 %v2664_v57 }
 0x184   :  { %884 = vmatpush1.bf16.msra.mxu0 %v2668_v58  ;;  %925 = vmatpush1.bf16.msra.mxu1 %v2670_v59 }
 0x185   :  { %885 = vmatprep.subr.bf16.mxu0 %v2674_v60  ;;  %926 = vmatprep.subr.bf16.mxu1 %v2676_v61 }
 0x188   :  { %886 = vmatpush1.bf16.msra.mxu0 %v2685_v63  ;;  %927 = vmatpush1.bf16.msra.mxu1 %v2687_v1 }
 0x189   :  { %887 = vmatprep.subr.bf16.mxu0 %v2691_v2  ;;  %928 = vmatprep.subr.bf16.mxu1 %v2693_v3 }
 0x18c   :  { %888 = vmatpush1.bf16.msra.mxu0 %v2697_v4  ;;  %929 = vmatpush1.bf16.msra.mxu1 %v2699_v5 }
 0x18d   :  { %988 = vmatprep.subr.bf16.mxu0 %v2591_v33  ;;  %1029 = vmatprep.subr.bf16.mxu1 %v2593_v34 }
 0x242   :  { %v792_v19 = vpop.f32.mrb[20].mxu0  ;;  %v833_v22 = vpop.f32.mrb[20].mxu1 }
 0x243   :  { %v840_v20 = vadd.f32 %v792_v19, %v2745_v10  ;;  %v842_v18 = vadd.f32 %v833_v22, %v2747_v11  ;;  %v794_v25 = vpop.f32.mrb[21].mxu0  ;;  %v835_v17 = vpop.f32.mrb[21].mxu1 }
 0x244   :  { %v841_v26 = vadd.f32 %v794_v25, %v2749_v12  ;;  %v843_v16 = vadd.f32 %v835_v17, %v2751_v13  ;;  %v796_v27 = vpop.f32.mrb[22].mxu0  ;;  %v837_v24 = vpop.f32.mrb[22].mxu1 }
 0x245   :  { %v844_v29 = vadd.f32 %v840_v20, %v2810_v44  ;;  %v797_v32 = vpop.f32.mrb[23].mxu0  ;;  %v838_v28 = vpop.f32.mrb[23].mxu1  ;;  %v846_v19 = vadd.f32 %v842_v18, %v2827_v9 }
 0x246   :  { %v845_v62 = vadd.f32 %v841_v26, %v2814_v0  ;;  %v847_v10 = vadd.f32 %v843_v16, %v2821_v6 }
 0x247   :  { %v2033_v30 = vmul.f32 -1.442695, %v844_v29 }
 0x248   :  { %v2034_v8 = vmul.f32 -1.442695, %v845_v62  ;;  %v2035_v11 = vmul.f32 -1.442695, %v847_v10 }
 0x249   :  { %2272 = vpow2.f32 %v2033_v30 }
 0x24a   :  { %2274 = vpow2.f32 %v2034_v8 }
 0x24b   :  { %2276 = vpow2.f32 %v2035_v11 }
 0x24c   :  { %2278 = vtanh.f32 %v846_v19 }
 0x253   :  { %v2273_v12 = vpop.eup %2272 }
 0x254   :  { %v2275_v22 = vpop.eup %2274  ;;  %v851_v13 = vadd.f32 1.0, %v2273_v12 }
 0x255   :  { %v857_v25 = vadd.f32 1.0, %v2275_v22  ;;  %v2277_v20 = vpop.eup %2276  ;;  %v3295_v22 = vld [vmem:[#allocation14_spill] sm:$0xff] }
 0x256   :  { %2280 = vrcp.f32 %v851_v13  ;;  %v2279_v17 = vpop.eup %2278  ;;  %v864_v29 = vadd.f32 1.0, %v2277_v20 }
 0x257   :  { %2282 = vrcp.f32 %v857_v25  ;;  %v3296_v25 = vld [vmem:[#allocation15_spill] sm:$0xff] }
 0x258   :  { %2284 = vrcp.f32 %v864_v29 }
 0x260   :  { %v2281_v26 = vpop.eup %2280 }
 0x261   :  { %v2283_v27 = vpop.eup %2282  ;;  %v868_v24 = vmul.f32 %v2281_v26, %v2279_v17 }
 0x262   :  { %v867_v32 = vmul.f32 %v2283_v27, %v2830_v53  ;;  %v2285_v18 = vpop.eup %2284 }
 0x264   :  { %v2876_v16 = vadd.f32 %v868_v24, %v867_v32 }
 0x266   :  { %2286 = vtanh.f32 %v2876_v16 }
 0x270   :  { %v2287_v28 = vpop.eup %2286 }
 0x271   :  { %v871_v62 = vmul.f32 %v2287_v28, %v2285_v18 }
 0x273   :  { %v872_v30 = vpack.c.bf16 %v871_v62, %v871_v62 }
 0x275   :  { %906 = vmatmul.mubr.bf16.vlgmr.msra.gmra.mrb[24].mxu0 %v872_v30  ;;  %947 = vmatmul.mubr.bf16.vlgmr.msra.gmra.mrb[24].mxu1 %v872_v30 }
 0x276   :  { %989 = vmatpush1.bf16.msra.mxu0 %v2598_v36  ;;  %1030 = vmatpush1.bf16.msra.mxu1 %v2600_v37 }
 0x277   :  { %990 = vmatprep.subr.bf16.mxu0 %v2604_v38  ;;  %1031 = vmatprep.subr.bf16.mxu1 %v2606_v39 }
 0x278   :  { %1020 = vmatprep.mubr.bf16.mxu0 %v3294_v21  ;;  %1061 = vmatprep.mubr.bf16.mxu1 %v3294_v21 }
 0x27a   :  { %991 = vmatpush1.bf16.msra.mxu0 %v2608_v40  ;;  %1032 = vmatpush1.bf16.msra.mxu1 %v2612_v41 }
 0x27b   :  { %992 = vmatprep.subr.bf16.mxu0 %v2616_v42  ;;  %1033 = vmatprep.subr.bf16.mxu1 %v2618_v43 }
 0x27e   :  { %993 = vmatpush1.bf16.msra.mxu0 %v2625_v45  ;;  %1034 = vmatpush1.bf16.msra.mxu1 %v2627_v46 }
 0x27f   :  { %994 = vmatprep.subr.bf16.mxu0 %v2631_v47  ;;  %1035 = vmatprep.subr.bf16.mxu1 %v2635_v48 }
 0x282   :  { %995 = vmatpush1.bf16.msra.mxu0 %v2637_v49  ;;  %1036 = vmatpush1.bf16.msra.mxu1 %v2639_v50 }
 0x283   :  { %996 = vmatprep.subr.bf16.mxu0 %v2643_v51  ;;  %1037 = vmatprep.subr.bf16.mxu1 %v2647_v52 }
 0x286   :  { %997 = vmatpush1.bf16.msra.mxu0 %v2656_v54  ;;  %1038 = vmatpush1.bf16.msra.mxu1 %v2658_v55 }
 0x287   :  { %998 = vmatprep.subr.bf16.mxu0 %v2662_v56  ;;  %1039 = vmatprep.subr.bf16.mxu1 %v2664_v57 }
 0x28a   :  { %999 = vmatpush1.bf16.msra.mxu0 %v2668_v58  ;;  %1040 = vmatpush1.bf16.msra.mxu1 %v2670_v59 }
 0x28b   :  { %1000 = vmatprep.subr.bf16.mxu0 %v2674_v60  ;;  %1041 = vmatprep.subr.bf16.mxu1 %v2676_v61 }
 0x28e   :  { %1001 = vmatpush1.bf16.msra.mxu0 %v2685_v63  ;;  %1042 = vmatpush1.bf16.msra.mxu1 %v2687_v1 }
 0x28f   :  { %1002 = vmatprep.subr.bf16.mxu0 %v2691_v2  ;;  %1043 = vmatprep.subr.bf16.mxu1 %v2693_v3 }
 0x292   :  { %1003 = vmatpush1.bf16.msra.mxu0 %v2697_v4  ;;  %1044 = vmatpush1.bf16.msra.mxu1 %v2699_v5 }
 0x293   :  { %1103 = vmatprep.subr.bf16.mxu0 %v2591_v33  ;;  %1144 = vmatprep.subr.bf16.mxu1 %v2593_v34 }
 0x348   :  { %v907_v53 = vpop.f32.mrb[24].mxu0  ;;  %v948_v8 = vpop.f32.mrb[24].mxu1 }
 0x349   :  { %v955_v10 = vadd.f32 %v907_v53, %v2753_v14  ;;  %v957_v11 = vadd.f32 %v948_v8, %v2755_v15  ;;  %v909_v19 = vpop.f32.mrb[25].mxu0  ;;  %v950_v12 = vpop.f32.mrb[25].mxu1 }
 0x34a   :  { %v956_v13 = vadd.f32 %v909_v19, %v3295_v22  ;;  %v958_v20 = vadd.f32 %v950_v12, %v3296_v25  ;;  %v911_v17 = vpop.f32.mrb[26].mxu0  ;;  %v952_v26 = vpop.f32.mrb[26].mxu1 }
 0x34b   :  { %v959_v27 = vadd.f32 %v955_v10, %v2810_v44  ;;  %v912_v24 = vpop.f32.mrb[27].mxu0  ;;  %v953_v29 = vpop.f32.mrb[27].mxu1  ;;  %v961_v62 = vadd.f32 %v957_v11, %v2827_v9 }
 0x34c   :  { %v960_v32 = vadd.f32 %v956_v13, %v2814_v0  ;;  %v962_v14 = vadd.f32 %v958_v20, %v2821_v6 }
 0x34d   :  { %v2036_v18 = vmul.f32 -1.442695, %v959_v27 }
 0x34e   :  { %v2037_v28 = vmul.f32 -1.442695, %v960_v32  ;;  %v2038_v15 = vmul.f32 -1.442695, %v962_v14  ;;  %v3298_v14 = vld [vmem:[#allocation17_spill] sm:$0xff] }
 0x34f   :  { %2288 = vpow2.f32 %v2036_v18  ;;  %v3297_v18 = vld [vmem:[#allocation16_spill] sm:$0xff] }
 0x350   :  { %2290 = vpow2.f32 %v2037_v28 }
 0x351   :  { %2292 = vpow2.f32 %v2038_v15 }
 0x352   :  { %2294 = vtanh.f32 %v961_v62 }
 0x359   :  { %v2289_v30 = vpop.eup %2288 }
 0x35a   :  { %v2291_v53 = vpop.eup %2290  ;;  %v966_v8 = vadd.f32 1.0, %v2289_v30 }
 0x35b   :  { %v972_v19 = vadd.f32 1.0, %v2291_v53  ;;  %v2293_v10 = vpop.eup %2292  ;;  %v3299_v53 = vld [vmem:[#allocation18_spill] sm:$0xff] }
 0x35c   :  { %2296 = vrcp.f32 %v966_v8  ;;  %v2295_v12 = vpop.eup %2294  ;;  %v979_v17 = vadd.f32 1.0, %v2293_v10 }
 0x35d   :  { %2298 = vrcp.f32 %v972_v19  ;;  %v3300_v19 = vld [vmem:[#allocation19_spill] sm:$0xff] }
 0x35e   :  { %2300 = vrcp.f32 %v979_v17 }
 0x366   :  { %v2297_v22 = vpop.eup %2296 }
 0x367   :  { %v2299_v13 = vpop.eup %2298  ;;  %v983_v25 = vmul.f32 %v2297_v22, %v2295_v12 }
 0x368   :  { %v982_v26 = vmul.f32 %v2299_v13, %v2876_v16  ;;  %v2301_v11 = vpop.eup %2300 }
 0x36a   :  { %v2922_v20 = vadd.f32 %v983_v25, %v982_v26 }
 0x36c   :  { %2302 = vtanh.f32 %v2922_v20 }
 0x376   :  { %v2303_v27 = vpop.eup %2302 }
 0x377   :  { %v986_v24 = vmul.f32 %v2303_v27, %v2301_v11 }
 0x379   :  { %v987_v29 = vpack.c.bf16 %v986_v24, %v986_v24 }
 0x37b   :  { %1021 = vmatmul.mubr.bf16.vlgmr.msra.gmra.mrb[28].mxu0 %v987_v29  ;;  %1062 = vmatmul.mubr.bf16.vlgmr.msra.gmra.mrb[28].mxu1 %v987_v29 }
 0x37c   :  { %1104 = vmatpush1.bf16.msra.mxu0 %v2598_v36  ;;  %1145 = vmatpush1.bf16.msra.mxu1 %v2600_v37 }
 0x37d   :  { %1105 = vmatprep.subr.bf16.mxu0 %v2604_v38  ;;  %1146 = vmatprep.subr.bf16.mxu1 %v2606_v39 }
 0x37e   :  { %1135 = vmatprep.mubr.bf16.mxu0 %v3294_v21  ;;  %1176 = vmatprep.mubr.bf16.mxu1 %v3294_v21 }
 0x380   :  { %1106 = vmatpush1.bf16.msra.mxu0 %v2608_v40  ;;  %1147 = vmatpush1.bf16.msra.mxu1 %v2612_v41 }
 0x381   :  { %1107 = vmatprep.subr.bf16.mxu0 %v2616_v42  ;;  %1148 = vmatprep.subr.bf16.mxu1 %v2618_v43 }
 0x384   :  { %1108 = vmatpush1.bf16.msra.mxu0 %v2625_v45  ;;  %1149 = vmatpush1.bf16.msra.mxu1 %v2627_v46 }
 0x385   :  { %1109 = vmatprep.subr.bf16.mxu0 %v2631_v47  ;;  %1150 = vmatprep.subr.bf16.mxu1 %v2635_v48 }
 0x388   :  { %1110 = vmatpush1.bf16.msra.mxu0 %v2637_v49  ;;  %1151 = vmatpush1.bf16.msra.mxu1 %v2639_v50 }
 0x389   :  { %1111 = vmatprep.subr.bf16.mxu0 %v2643_v51  ;;  %1152 = vmatprep.subr.bf16.mxu1 %v2647_v52 }
 0x38c   :  { %1112 = vmatpush1.bf16.msra.mxu0 %v2656_v54  ;;  %1153 = vmatpush1.bf16.msra.mxu1 %v2658_v55 }
 0x38d   :  { %1113 = vmatprep.subr.bf16.mxu0 %v2662_v56  ;;  %1154 = vmatprep.subr.bf16.mxu1 %v2664_v57 }
 0x390   :  { %1114 = vmatpush1.bf16.msra.mxu0 %v2668_v58  ;;  %1155 = vmatpush1.bf16.msra.mxu1 %v2670_v59 }
 0x391   :  { %1115 = vmatprep.subr.bf16.mxu0 %v2674_v60  ;;  %1156 = vmatprep.subr.bf16.mxu1 %v2676_v61 }
 0x394   :  { %1116 = vmatpush1.bf16.msra.mxu0 %v2685_v63  ;;  %1157 = vmatpush1.bf16.msra.mxu1 %v2687_v1 }
 0x395   :  { %1117 = vmatprep.subr.bf16.mxu0 %v2691_v2  ;;  %1158 = vmatprep.subr.bf16.mxu1 %v2693_v3 }
 0x398   :  { %1118 = vmatpush1.bf16.msra.mxu0 %v2697_v4  ;;  %1159 = vmatpush1.bf16.msra.mxu1 %v2699_v5 }
 0x399   :  { %1218 = vmatprep.subr.bf16.mxu0 %v2591_v33  ;;  %1259 = vmatprep.subr.bf16.mxu1 %v2593_v34 }
 0x44e   :  { %v1022_v16 = vpop.f32.mrb[28].mxu0  ;;  %v1063_v32 = vpop.f32.mrb[28].mxu1 }
 0x44f   :  { %v1070_v28 = vadd.f32 %v1022_v16, %v3297_v18  ;;  %v1072_v15 = vadd.f32 %v1063_v32, %v3298_v14  ;;  %v1024_v62 = vpop.f32.mrb[29].mxu0  ;;  %v1065_v30 = vpop.f32.mrb[29].mxu1 }
 0x450   :  { %v1071_v8 = vadd.f32 %v1024_v62, %v3299_v53  ;;  %v1073_v10 = vadd.f32 %v1065_v30, %v3300_v19  ;;  %v1026_v12 = vpop.f32.mrb[30].mxu0  ;;  %v1067_v22 = vpop.f32.mrb[30].mxu1 }
 0x451   :  { %v1074_v13 = vadd.f32 %v1070_v28, %v2810_v44  ;;  %v1027_v25 = vpop.f32.mrb[31].mxu0  ;;  %v1068_v33 = vpop.f32.mrb[31].mxu1  ;;  %v1076_v29 = vadd.f32 %v1072_v15, %v2827_v9 }
 0x452   :  { %v1075_v17 = vadd.f32 %v1071_v8, %v2814_v0  ;;  %v1077_v27 = vadd.f32 %v1073_v10, %v2821_v6 }
 0x453   :  { %v2039_v26 = vmul.f32 -1.442695, %v1074_v13 }
 0x454   :  { %v2040_v11 = vmul.f32 -1.442695, %v1075_v17  ;;  %v2041_v24 = vmul.f32 -1.442695, %v1077_v27 }
 0x455   :  { %2304 = vpow2.f32 %v2039_v26 }
 0x456   :  { %2306 = vpow2.f32 %v2040_v11 }
 0x457   :  { %2308 = vpow2.f32 %v2041_v24 }
 0x458   :  { %2310 = vtanh.f32 %v1076_v29 }
 0x45f   :  { %v2305_v16 = vpop.eup %2304 }
 0x460   :  { %v2307_v32 = vpop.eup %2306  ;;  %v1081_v18 = vadd.f32 1.0, %v2305_v16 }
 0x461   :  { %v1087_v14 = vadd.f32 1.0, %v2307_v32  ;;  %v2309_v28 = vpop.eup %2308 }
 0x462   :  { %2312 = vrcp.f32 %v1081_v18  ;;  %v2311_v62 = vpop.eup %2310  ;;  %v1094_v19 = vadd.f32 1.0, %v2309_v28 }
 0x463   :  { %2314 = vrcp.f32 %v1087_v14 }
 0x464   :  { %2316 = vrcp.f32 %v1094_v19 }
 0x46c   :  { %v2313_v30 = vpop.eup %2312 }
 0x46d   :  { %v2315_v53 = vpop.eup %2314  ;;  %v1098_v8 = vmul.f32 %v2313_v30, %v2311_v62 }
 0x46e   :  { %v1097_v12 = vmul.f32 %v2315_v53, %v2922_v20  ;;  %v2317_v15 = vpop.eup %2316 }
 0x470   :  { %v2968_v10 = vadd.f32 %v1098_v8, %v1097_v12 }
 0x472   :  { %2318 = vtanh.f32 %v2968_v10 }
 0x47c   :  { %v2319_v22 = vpop.eup %2318 }
 0x47d   :  { %v1101_v13 = vmul.f32 %v2319_v22, %v2317_v15 }
 0x47f   :  { %v1102_v25 = vpack.c.bf16 %v1101_v13, %v1101_v13 }
 0x481   :  { %1136 = vmatmul.mubr.bf16.vlgmr.msra.gmra.mrb[32].mxu0 %v1102_v25  ;;  %1177 = vmatmul.mubr.bf16.vlgmr.msra.gmra.mrb[32].mxu1 %v1102_v25 }
 0x482   :  { %1219 = vmatpush1.bf16.msra.mxu0 %v2598_v36  ;;  %1260 = vmatpush1.bf16.msra.mxu1 %v2600_v37  ;;  %v3003_v36 = vld [vmem:[#allocation6 + $0x4] ss:$16 sps:$4 sm:$0xff]  }
 0x483   :  { %1220 = vmatprep.subr.bf16.mxu0 %v2604_v38  ;;  %1261 = vmatprep.subr.bf16.mxu1 %v2606_v39  ;;  %v3301_v39 = vld [vmem:[#allocation20_spill] sm:$0xff] }
 0x484   :  { %1250 = vmatprep.mubr.bf16.mxu0 %v3294_v21  ;;  %1291 = vmatprep.mubr.bf16.mxu1 %v3294_v21 }
 0x486   :  { %1221 = vmatpush1.bf16.msra.mxu0 %v2608_v40  ;;  %1262 = vmatpush1.bf16.msra.mxu1 %v2612_v41  ;;  %v3302_v41 = vld [vmem:[#allocation21_spill] sm:$0xff] }
 0x487   :  { %1222 = vmatprep.subr.bf16.mxu0 %v2616_v42  ;;  %1263 = vmatprep.subr.bf16.mxu1 %v2618_v43 }
 0x48a   :  { %1223 = vmatpush1.bf16.msra.mxu0 %v2625_v45  ;;  %1264 = vmatpush1.bf16.msra.mxu1 %v2627_v46  ;;  %v3303_v46 = vld [vmem:[#allocation22_spill] sm:$0xff] }
 0x48b   :  { %1224 = vmatprep.subr.bf16.mxu0 %v2631_v47  ;;  %1265 = vmatprep.subr.bf16.mxu1 %v2635_v48  ;;  %v3304_v48 = vld [vmem:[#allocation23_spill] sm:$0xff] }
 0x48e   :  { %1225 = vmatpush1.bf16.msra.mxu0 %v2637_v49  ;;  %1266 = vmatpush1.bf16.msra.mxu1 %v2639_v50 }
 0x48f   :  { %1226 = vmatprep.subr.bf16.mxu0 %v2643_v51  ;;  %1267 = vmatprep.subr.bf16.mxu1 %v2647_v52 }
 0x492   :  { %1227 = vmatpush1.bf16.msra.mxu0 %v2656_v54  ;;  %1268 = vmatpush1.bf16.msra.mxu1 %v2658_v55 }
 0x493   :  { %1228 = vmatprep.subr.bf16.mxu0 %v2662_v56  ;;  %1269 = vmatprep.subr.bf16.mxu1 %v2664_v57 }
 0x496   :  { %1229 = vmatpush1.bf16.msra.mxu0 %v2668_v58  ;;  %1270 = vmatpush1.bf16.msra.mxu1 %v2670_v59 }
 0x497   :  { %1230 = vmatprep.subr.bf16.mxu0 %v2674_v60  ;;  %1271 = vmatprep.subr.bf16.mxu1 %v2676_v61 }
 0x49a   :  { %1231 = vmatpush1.bf16.msra.mxu0 %v2685_v63  ;;  %1272 = vmatpush1.bf16.msra.mxu1 %v2687_v1 }
 0x49b   :  { %1232 = vmatprep.subr.bf16.mxu0 %v2691_v2  ;;  %1273 = vmatprep.subr.bf16.mxu1 %v2693_v3 }
 0x49e   :  { %1233 = vmatpush1.bf16.msra.mxu0 %v2697_v4  ;;  %1274 = vmatpush1.bf16.msra.mxu1 %v2699_v5 }
 0x49f   :  { %1333 = vmatprep.subr.bf16.mxu0 %v3003_v36  ;;  %1374 = vmatprep.subr.bf16.mxu1 %v2593_v34 }
 0x554   :  { %v1137_v37 = vpop.f32.mrb[32].mxu0  ;;  %v1178_v38 = vpop.f32.mrb[32].mxu1 }
 0x555   :  { %v1185_v40 = vadd.f32 %v1137_v37, %v3301_v39  ;;  %v1187_v42 = vadd.f32 %v1178_v38, %v3302_v41  ;;  %v1139_v43 = vpop.f32.mrb[33].mxu0  ;;  %v1180_v45 = vpop.f32.mrb[33].mxu1  ;;  %v3019_v39 = vld [vmem:[#allocation6] ss:$16 sps:$4 sm:$0xff]   ;;  %v3028_v41 = vld [vmem:[#allocation6 + $0x2c] ss:$16 sps:$4 sm:$0xff]  }
 0x556   :  { %v1186_v47 = vadd.f32 %v1139_v43, %v3303_v46  ;;  %v1188_v49 = vadd.f32 %v1180_v45, %v3304_v48  ;;  %v1141_v50 = vpop.f32.mrb[34].mxu0  ;;  %v1182_v20 = vpop.f32.mrb[34].mxu1  ;;  %v3036_v43 = vld [vmem:[#allocation6 + $0x28] ss:$16 sps:$4 sm:$0xff]   ;;  %v3039_v45 = vld [vmem:[#allocation6 + $0x44] ss:$16 sps:$4 sm:$0xff]  }
 0x557   :  { %v1189_v33 = vadd.f32 %v1185_v40, %v2810_v44  ;;  %v1142_v17 = vpop.f32.mrb[35].mxu0  ;;  %v1183_v26 = vpop.f32.mrb[35].mxu1  ;;  %v1191_v16 = vadd.f32 %v1187_v42, %v2827_v9  ;;  %v3022_v40 = vld [vmem:[#allocation6 + $0x8] ss:$16 sps:$4 sm:$0xff]   ;;  %v3033_v42 = vld [vmem:[#allocation6 + $0x20] ss:$16 sps:$4 sm:$0xff]  }
 0x558   :  { %v1190_v34 = vadd.f32 %v1186_v47, %v2814_v0  ;;  %v1192_v24 = vadd.f32 %v1188_v49, %v2821_v6  ;;  %v3042_v46 = vld [vmem:[#allocation6 + $0x4c] ss:$16 sps:$4 sm:$0xff]   ;;  %v3045_v47 = vld [vmem:[#allocation6 + $0x40] ss:$16 sps:$4 sm:$0xff]   ;;  %v3048_v48 = vld [vmem:[#allocation6 + $0x48] ss:$16 sps:$4 sm:$0xff]  }
 0x559   :  { %v2042_v11 = vmul.f32 -1.442695, %v1189_v33  ;;  %v3051_v49 = vld [vmem:[#allocation6 + $0x64] ss:$16 sps:$4 sm:$0xff]   ;;  %v3054_v50 = vld [vmem:[#allocation6 + $0x6c] ss:$16 sps:$4 sm:$0xff]  }
 0x55a   :  { %v2043_v27 = vmul.f32 -1.442695, %v1190_v34  ;;  %v2044_v29 = vmul.f32 -1.442695, %v1192_v24  ;;  %v3057_v20 = vld [vmem:[#allocation6 + $0x60] ss:$16 sps:$4 sm:$0xff]  }
 0x55b   :  { %2320 = vpow2.f32 %v2042_v11  ;;  %v3060_v33 = vld [vmem:[#allocation6 + $0x68] ss:$16 sps:$4 sm:$0xff]  }
 0x55c   :  { %2322 = vpow2.f32 %v2043_v27 }
 0x55d   :  { %2324 = vpow2.f32 %v2044_v29 }
 0x55e   :  { %2326 = vtanh.f32 %v1191_v16 }
 0x565   :  { %v2321_v32 = vpop.eup %2320 }
 0x566   :  { %v2323_v18 = vpop.eup %2322  ;;  %v1196_v14 = vadd.f32 1.0, %v2321_v32 }
 0x567   :  { %v1202_v28 = vadd.f32 1.0, %v2323_v18  ;;  %v2325_v62 = vpop.eup %2324 }
 0x568   :  { %2328 = vrcp.f32 %v1196_v14  ;;  %v2327_v30 = vpop.eup %2326  ;;  %v1209_v12 = vadd.f32 1.0, %v2325_v62 }
 0x569   :  { %2330 = vrcp.f32 %v1202_v28 }
 0x56a   :  { %2332 = vrcp.f32 %v1209_v12 }
 0x572   :  { %v2329_v53 = vpop.eup %2328 }
 0x573   :  { %v2331_v8 = vpop.eup %2330  ;;  %v1213_v19 = vmul.f32 %v2329_v53, %v2327_v30 }
 0x574   :  { %v1212_v15 = vmul.f32 %v2331_v8, %v2968_v10  ;;  %v2333_v13 = vpop.eup %2332  ;;  %v3025_v10 = vld [vmem:[#allocation6 + $0x24] ss:$16 sps:$4 sm:$0xff]  }
 0x576   :  { %v3016_v22 = vadd.f32 %v1213_v19, %v1212_v15 }
 0x578   :  { %2334 = vtanh.f32 %v3016_v22 }
 0x582   :  { %v2335_v25 = vpop.eup %2334 }
 0x583   :  { %v1216_v37 = vmul.f32 %v2335_v25, %v2333_v13 }
 0x585   :  { %v1217_v38 = vpack.c.bf16 %v1216_v37, %v1216_v37 }
 0x587   :  { %1251 = vmatmul.mubr.bf16.vlgmr.msra.gmra.mrb[36].mxu0 %v1217_v38  ;;  %1292 = vmatmul.mubr.bf16.vlgmr.msra.gmra.mrb[36].mxu1 %v1217_v38 }
 0x588   :  { %1334 = vmatpush1.bf16.msra.mxu0 %v3019_v39  ;;  %1375 = vmatpush1.bf16.msra.mxu1 %v3022_v40 }
 0x589   :  { %1335 = vmatprep.subr.bf16.mxu0 %v3025_v10  ;;  %1376 = vmatprep.subr.bf16.mxu1 %v3028_v41 }
 0x58a   :  { %1365 = vmatprep.mubr.bf16.mxu0 %v3294_v21  ;;  %1406 = vmatprep.mubr.bf16.mxu1 %v3294_v21 }
 0x58c   :  { %1336 = vmatpush1.bf16.msra.mxu0 %v3033_v42  ;;  %1377 = vmatpush1.bf16.msra.mxu1 %v3036_v43 }
 0x58d   :  { %1337 = vmatprep.subr.bf16.mxu0 %v3039_v45  ;;  %1378 = vmatprep.subr.bf16.mxu1 %v3042_v46 }
 0x590   :  { %1338 = vmatpush1.bf16.msra.mxu0 %v3045_v47  ;;  %1379 = vmatpush1.bf16.msra.mxu1 %v3048_v48 }
 0x591   :  { %1339 = vmatprep.subr.bf16.mxu0 %v3051_v49  ;;  %1380 = vmatprep.subr.bf16.mxu1 %v3054_v50 }
 0x594   :  { %1340 = vmatpush1.bf16.msra.mxu0 %v3057_v20  ;;  %1381 = vmatpush1.bf16.msra.mxu1 %v3060_v33 }
 0x595   :  { %1341 = vmatprep.subr.bf16.mxu0 %v2643_v51  ;;  %1382 = vmatprep.subr.bf16.mxu1 %v2647_v52  ;;  %v2409_v51 = vld [vmem:[#allocation6 + $0xc] ss:$16 sps:$4 sm:$0xff]  }
 0x598   :  { %1342 = vmatpush1.bf16.msra.mxu0 %v2656_v54  ;;  %1383 = vmatpush1.bf16.msra.mxu1 %v2658_v55  ;;  %v3305_v55 = vld [vmem:[#allocation24_spill] sm:$0xff] }
 0x599   :  { %1343 = vmatprep.subr.bf16.mxu0 %v2662_v56  ;;  %1384 = vmatprep.subr.bf16.mxu1 %v2664_v57  ;;  %v3306_v57 = vld [vmem:[#allocation25_spill] sm:$0xff] }
 0x59c   :  { %1344 = vmatpush1.bf16.msra.mxu0 %v2668_v58  ;;  %1385 = vmatpush1.bf16.msra.mxu1 %v2670_v59 }
 0x59d   :  { %1345 = vmatprep.subr.bf16.mxu0 %v2674_v60  ;;  %1386 = vmatprep.subr.bf16.mxu1 %v2676_v61  ;;  %v3307_v61 = vld [vmem:[#allocation26_spill] sm:$0xff] }
 0x5a0   :  { %1346 = vmatpush1.bf16.msra.mxu0 %v2685_v63  ;;  %1387 = vmatpush1.bf16.msra.mxu1 %v2687_v1  ;;  %v3308_v1 = vld [vmem:[#allocation27_spill] sm:$0xff] }
 0x5a1   :  { %1347 = vmatprep.subr.bf16.mxu0 %v2691_v2  ;;  %1388 = vmatprep.subr.bf16.mxu1 %v2693_v3 }
 0x5a4   :  { %1348 = vmatpush1.bf16.msra.mxu0 %v2697_v4  ;;  %1389 = vmatpush1.bf16.msra.mxu1 %v2699_v5 }
 0x5a5   :  { %1448 = vmatprep.subr.bf16.mxu0 %v3003_v36  ;;  %1489 = vmatprep.subr.bf16.mxu1 %v2409_v51 }
 0x65a   :  { %v1252_v52 = vpop.f32.mrb[36].mxu0  ;;  %v1293_v54 = vpop.f32.mrb[36].mxu1 }
 0x65b   :  { %v1300_v56 = vadd.f32 %v1252_v52, %v3305_v55  ;;  %v1302_v58 = vadd.f32 %v1293_v54, %v3306_v57  ;;  %v1254_v59 = vpop.f32.mrb[37].mxu0  ;;  %v1295_v60 = vpop.f32.mrb[37].mxu1  ;;  %v3309_v54 = vld [vmem:[#allocation28_spill] sm:$0xff] }
 0x65c   :  { %v1301_v63 = vadd.f32 %v1254_v59, %v3307_v61  ;;  %v1303_v2 = vadd.f32 %v1295_v60, %v3308_v1  ;;  %v1256_v3 = vpop.f32.mrb[38].mxu0  ;;  %v1297_v4 = vpop.f32.mrb[38].mxu1  ;;  %v3311_v60 = vld [vmem:[#allocation30_spill] sm:$0xff] }
 0x65d   :  { %v1304_v5 = vadd.f32 %v1300_v56, %v2810_v44  ;;  %v1257_v17 = vpop.f32.mrb[39].mxu0  ;;  %v1298_v36 = vpop.f32.mrb[39].mxu1  ;;  %v1306_v29 = vadd.f32 %v1302_v58, %v2827_v9  ;;  %v3310_v56 = vld [vmem:[#allocation29_spill] sm:$0xff] }
 0x65e   :  { %v1305_v26 = vadd.f32 %v1301_v63, %v2814_v0  ;;  %v1307_v27 = vadd.f32 %v1303_v2, %v2821_v6  ;;  %v3312_v63 = vld [vmem:[#allocation31_spill] sm:$0xff] }
 0x65f   :  { %v2045_v34 = vmul.f32 -1.442695, %v1304_v5 }
 0x660   :  { %v2046_v11 = vmul.f32 -1.442695, %v1305_v26  ;;  %v2047_v24 = vmul.f32 -1.442695, %v1307_v27 }
 0x661   :  { %2336 = vpow2.f32 %v2045_v34 }
 0x662   :  { %2338 = vpow2.f32 %v2046_v11 }
 0x663   :  { %2340 = vpow2.f32 %v2047_v24 }
 0x664   :  { %2342 = vtanh.f32 %v1306_v29 }
 0x66b   :  { %v2337_v16 = vpop.eup %2336 }
 0x66c   :  { %v2339_v32 = vpop.eup %2338  ;;  %v1311_v18 = vadd.f32 1.0, %v2337_v16 }
 0x66d   :  { %v1317_v14 = vadd.f32 1.0, %v2339_v32  ;;  %v2341_v28 = vpop.eup %2340 }
 0x66e   :  { %2344 = vrcp.f32 %v1311_v18  ;;  %v2343_v62 = vpop.eup %2342  ;;  %v1324_v19 = vadd.f32 1.0, %v2341_v28 }
 0x66f   :  { %2346 = vrcp.f32 %v1317_v14 }
 0x670   :  { %2348 = vrcp.f32 %v1324_v19 }
 0x678   :  { %v2345_v30 = vpop.eup %2344 }
 0x679   :  { %v2347_v53 = vpop.eup %2346  ;;  %v1328_v8 = vmul.f32 %v2345_v30, %v2343_v62 }
 0x67a   :  { %v1327_v12 = vmul.f32 %v2347_v53, %v3016_v22  ;;  %v2349_v13 = vpop.eup %2348  ;;  %v2411_v22 = vld [vmem:[#allocation6 + $0x8c] ss:$16 sps:$4 sm:$0xff]  }
 0x67c   :  { %v3089_v15 = vadd.f32 %v1328_v8, %v1327_v12 }
 0x67e   :  { %2350 = vtanh.f32 %v3089_v15 }
 0x688   :  { %v2351_v25 = vpop.eup %2350 }
 0x689   :  { %v1331_v37 = vmul.f32 %v2351_v25, %v2349_v13 }
 0x68b   :  { %v1332_v38 = vpack.c.bf16 %v1331_v37, %v1331_v37 }
 0x68d   :  { %1366 = vmatmul.mubr.bf16.vlgmr.msra.gmra.mrb[40].mxu0 %v1332_v38  ;;  %1407 = vmatmul.mubr.bf16.vlgmr.msra.gmra.mrb[40].mxu1 %v1332_v38 }
 0x68e   :  { %1449 = vmatpush1.bf16.msra.mxu0 %v3019_v39  ;;  %1490 = vmatpush1.bf16.msra.mxu1 %v3022_v40  ;;  %v2412_v39 = vld [vmem:[#allocation6 + $0x80] ss:$16 sps:$4 sm:$0xff]   ;;  %v2413_v40 = vld [vmem:[#allocation6 + $0x88] ss:$16 sps:$4 sm:$0xff]  }
 0x68f   :  { %1450 = vmatprep.subr.bf16.mxu0 %v3025_v10  ;;  %1491 = vmatprep.subr.bf16.mxu1 %v3028_v41  ;;  %v2414_v10 = vld [vmem:[#allocation6 + $0xa4] ss:$16 sps:$4 sm:$0xff]   ;;  %v2415_v41 = vld [vmem:[#allocation6 + $0xac] ss:$16 sps:$4 sm:$0xff]  }
 0x690   :  { %1480 = vmatprep.mubr.bf16.mxu0 %v3294_v21  ;;  %1521 = vmatprep.mubr.bf16.mxu1 %v3294_v21  ;;  %v2410_v21 = vld [vmem:[#allocation6 + $0x84] ss:$16 sps:$4 sm:$0xff]  }
 0x692   :  { %1451 = vmatpush1.bf16.msra.mxu0 %v3033_v42  ;;  %1492 = vmatpush1.bf16.msra.mxu1 %v3036_v43  ;;  %v2416_v42 = vld [vmem:[#allocation6 + $0xa0] ss:$16 sps:$4 sm:$0xff]   ;;  %v2417_v43 = vld [vmem:[#allocation6 + $0xa8] ss:$16 sps:$4 sm:$0xff]  }
 0x693   :  { %1452 = vmatprep.subr.bf16.mxu0 %v3039_v45  ;;  %1493 = vmatprep.subr.bf16.mxu1 %v3042_v46  ;;  %v2418_v45 = vld [vmem:[#allocation6 + $0xc4] ss:$16 sps:$4 sm:$0xff]   ;;  %v2419_v46 = vld [vmem:[#allocation6 + $0xcc] ss:$16 sps:$4 sm:$0xff]  }
 0x696   :  { %1453 = vmatpush1.bf16.msra.mxu0 %v3045_v47  ;;  %1494 = vmatpush1.bf16.msra.mxu1 %v3048_v48  ;;  %v2420_v47 = vld [vmem:[#allocation6 + $0xc0] ss:$16 sps:$4 sm:$0xff]   ;;  %v2421_v48 = vld [vmem:[#allocation6 + $0xc8] ss:$16 sps:$4 sm:$0xff]  }
 0x697   :  { %1454 = vmatprep.subr.bf16.mxu0 %v3051_v49  ;;  %1495 = vmatprep.subr.bf16.mxu1 %v3054_v50  ;;  %v2422_v49 = vld [vmem:[#allocation6 + $0xe4] ss:$16 sps:$4 sm:$0xff]   ;;  %v2423_v50 = vld [vmem:[#allocation6 + $0xec] ss:$16 sps:$4 sm:$0xff]  }
 0x69a   :  { %1455 = vmatpush1.bf16.msra.mxu0 %v3057_v20  ;;  %1496 = vmatpush1.bf16.msra.mxu1 %v3060_v33  ;;  %v2424_v20 = vld [vmem:[#allocation6 + $0xe0] ss:$16 sps:$4 sm:$0xff]   ;;  %v2425_v33 = vld [vmem:[#allocation6 + $0xe8] ss:$16 sps:$4 sm:$0xff]  }
 0x69b   :  { %1456 = vmatprep.subr.bf16.mxu0 %v2410_v21  ;;  %1497 = vmatprep.subr.bf16.mxu1 %v2411_v22  ;;  %v1568_v21 = vld [vmem:[%s3264_s4] sm:$0xff]  ;;  %v1569_v22 = vld [vmem:[%s3264_s4 + $0x8] sm:$0xff] }
 0x69e   :  { %1457 = vmatpush1.bf16.msra.mxu0 %v2412_v39  ;;  %1498 = vmatpush1.bf16.msra.mxu1 %v2413_v40  ;;  %v2515_v39 = vmov 0.0|0.0   ;;  %v2118_v40 = vpack.c.bf16 %v1569_v22, %v1568_v21  ;;  %v2517_v21 = vmov 0.0  }
 0x69f   :  { %1458 = vmatprep.subr.bf16.mxu0 %v2414_v10  ;;  %1499 = vmatprep.subr.bf16.mxu1 %v2415_v41  ;;  %v1571_v10 = vld [vmem:[%s3264_s4 + $0x18] sm:$0xff] }
 0x6a2   :  { %1459 = vmatpush1.bf16.msra.mxu0 %v2416_v42  ;;  %1500 = vmatpush1.bf16.msra.mxu1 %v2417_v43  ;;  %v1572_v42 = vld [vmem:[%s3264_s4 + $0x20] sm:$0xff]  ;;  %v1573_v43 = vld [vmem:[%s3264_s4 + $0x28] sm:$0xff] }
 0x6a3   :  { %1460 = vmatprep.subr.bf16.mxu0 %v2418_v45  ;;  %1501 = vmatprep.subr.bf16.mxu1 %v2419_v46  ;;  %v2124_v45 = vpack.c.bf16 %v1573_v43, %v1572_v42  ;;  %v1574_v46 = vld [vmem:[%s3264_s4 + $0x30] sm:$0xff] }
 0x6a6   :  { %1461 = vmatpush1.bf16.msra.mxu0 %v2420_v47  ;;  %1502 = vmatpush1.bf16.msra.mxu1 %v2421_v48  ;;  %v1575_v47 = vld [vmem:[%s3264_s4 + $0x38] sm:$0xff] }
 0x6a7   :  { %1462 = vmatprep.subr.bf16.mxu0 %v2422_v49  ;;  %1503 = vmatprep.subr.bf16.mxu1 %v2423_v50  ;;  %v2127_v48 = vpack.c.bf16 %v1575_v47, %v1574_v46 }
 0x6aa   :  { %1463 = vmatpush1.bf16.msra.mxu0 %v2424_v20  ;;  %1504 = vmatpush1.bf16.msra.mxu1 %v2425_v33  ;;  %v3313_v20 = vld [vmem:[#allocation32_spill] sm:$0xff] }
 0x6ab   :  { %2117 = vmatprep.subr.bf16.mxu0 %v2515_v39  ;;  %2141 = vmatprep.subr.bf16.mxu1 %v2515_v39 }
 0x760   :  { %v1367_v51 = vpop.f32.mrb[40].mxu0  ;;  %v1408_v52 = vpop.f32.mrb[40].mxu1 }
 0x761   :  { %v1415_v55 = vadd.f32 %v1367_v51, %v3309_v54  ;;  %v1417_v57 = vadd.f32 %v1408_v52, %v3310_v56  ;;  %v1369_v58 = vpop.f32.mrb[41].mxu0  ;;  %v1410_v59 = vpop.f32.mrb[41].mxu1  ;;  %v3314_v51 = vld [vmem:[#allocation33_spill] sm:$0xff]  ;;  %v3315_v56 = vld [vmem:[#allocation34_spill] sm:$0xff] }
 0x762   :  { %v1416_v61 = vadd.f32 %v1369_v58, %v3311_v60  ;;  %v1418_v1 = vadd.f32 %v1410_v59, %v3312_v63  ;;  %v1371_v2 = vpop.f32.mrb[42].mxu0  ;;  %v1412_v3 = vpop.f32.mrb[42].mxu1  ;;  %v3316_v58 = vld [vmem:[#allocation35_spill] sm:$0xff] }
 0x763   :  { %v1419_v4 = vadd.f32 %v1415_v55, %v2810_v44  ;;  %v1372_v5 = vpop.f32.mrb[43].mxu0  ;;  %v1413_v17 = vpop.f32.mrb[43].mxu1  ;;  %v1421_v24 = vadd.f32 %v1417_v57, %v2827_v9 }
 0x764   :  { %v1420_v36 = vadd.f32 %v1416_v61, %v2814_v0  ;;  %v1422_v11 = vadd.f32 %v1418_v1, %v2821_v6 }
 0x765   :  { %v2048_v26 = vmul.f32 -1.442695, %v1419_v4 }
 0x766   :  { %v2049_v34 = vmul.f32 -1.442695, %v1420_v36  ;;  %v2050_v27 = vmul.f32 -1.442695, %v1422_v11 }
 0x767   :  { %2352 = vpow2.f32 %v2048_v26 }
 0x768   :  { %2354 = vpow2.f32 %v2049_v34 }
 0x769   :  { %2356 = vpow2.f32 %v2050_v27 }
 0x76a   :  { %2358 = vtanh.f32 %v1421_v24 }
 0x771   :  { %v2353_v29 = vpop.eup %2352 }
 0x772   :  { %v2355_v16 = vpop.eup %2354  ;;  %v1426_v32 = vadd.f32 1.0, %v2353_v29 }
 0x773   :  { %v1432_v18 = vadd.f32 1.0, %v2355_v16  ;;  %v2357_v14 = vpop.eup %2356 }
 0x774   :  { %2360 = vrcp.f32 %v1426_v32  ;;  %v2359_v28 = vpop.eup %2358  ;;  %v1439_v8 = vadd.f32 1.0, %v2357_v14 }
 0x775   :  { %2362 = vrcp.f32 %v1432_v18 }
 0x776   :  { %2364 = vrcp.f32 %v1439_v8  ;;  %v1577_v8 = vld [vmem:[%s3264_s4 + $0x48] sm:$0xff] }
 0x77e   :  { %v2361_v62 = vpop.eup %2360 }
 0x77f   :  { %v2363_v30 = vpop.eup %2362  ;;  %v1443_v53 = vmul.f32 %v2361_v62, %v2359_v28 }
 0x780   :  { %v1442_v19 = vmul.f32 %v2363_v30, %v3089_v15  ;;  %v2365_v13 = vpop.eup %2364  ;;  %v1570_v15 = vld [vmem:[%s3264_s4 + $0x10] sm:$0xff] }
 0x781   :  { %v2121_v41 = vpack.c.bf16 %v1571_v10, %v1570_v15  ;;  %v1582_v15 = vld [vmem:[%s3264_s4 + $0x70] sm:$0xff] }
 0x782   :  { %v3117_v12 = vadd.f32 %v1443_v53, %v1442_v19  ;;  %v1576_v53 = vld [vmem:[%s3264_s4 + $0x40] sm:$0xff] }
 0x783   :  { %v2130_v19 = vpack.c.bf16 %v1577_v8, %v1576_v53 }
 0x784   :  { %2366 = vtanh.f32 %v3117_v12 }
 0x78e   :  { %v2367_v25 = vpop.eup %2366 }
 0x78f   :  { %v1446_v37 = vmul.f32 %v2367_v25, %v2365_v13  ;;  %v1579_v13 = vld [vmem:[%s3264_s4 + $0x58] sm:$0xff]  ;;  %v1580_v25 = vld [vmem:[%s3264_s4 + $0x60] sm:$0xff] }
 0x791   :  { %v1447_v38 = vpack.c.bf16 %v1446_v37, %v1446_v37 }
 0x793   :  { %1481 = vmatmul.mubr.bf16.vlgmr.msra.gmra.mrb[44].mxu0 %v1447_v38  ;;  %1522 = vmatmul.mubr.bf16.vlgmr.msra.gmra.mrb[44].mxu1 %v1447_v38  ;;  %v1581_v38 = vld [vmem:[%s3264_s4 + $0x68] sm:$0xff] }
 0x794   :  { %2119 = vmatpush3.bf16.msra.mxu0 %v2118_v40  ;;  %2107 = vmatprep.mubr.msk.f32.mxu0 %vm2516_vm0, %v2517_v21  ;;  %v2136_v22 = vpack.c.bf16 %v1581_v38, %v1580_v25  ;;  %v1583_v40 = vld [vmem:[%s3264_s4 + $0x78] sm:$0xff] }
 0x795   :  { %2120 = vmatprep.subr.bf16.mxu0 %v2515_v39  ;;  %2114 = vmatprep.mubr.msk.f32.mxu1 %vm2516_vm0, %v2517_v21  ;;  %v2139_v10 = vpack.c.bf16 %v1583_v40, %v1582_v15  ;;  %v3317_v15 = vsub.s32 0, %v2785_v31 }
 0x798   :  { %2122 = vmatpush3.bf16.msra.mxu0 %v2121_v41 }
 0x799   :  { %2123 = vmatprep.subr.bf16.mxu0 %v2515_v39 }
 0x79c   :  { %2125 = vmatpush3.bf16.msra.mxu0 %v2124_v45 }
 0x79d   :  { %2126 = vmatprep.subr.bf16.mxu0 %v2515_v39 }
 0x7a0   :  { %2128 = vmatpush3.bf16.msra.mxu0 %v2127_v48 }
 0x7a1   :  { %2129 = vmatprep.subr.bf16.mxu0 %v2515_v39 }
 0x7a4   :  { %2131 = vmatpush3.bf16.msra.mxu0 %v2130_v19 }
 0x7a5   :  { %2132 = vmatprep.subr.bf16.mxu0 %v2515_v39 }
 0x866   :  { %v1482_v49 = vpop.f32.mrb[44].mxu0  ;;  %v1523_v50 = vpop.f32.mrb[44].mxu1 }
 0x867   :  { %v1530_v33 = vadd.f32 %v1482_v49, %v3313_v20  ;;  %v1532_v52 = vadd.f32 %v1523_v50, %v3314_v51  ;;  %v1484_v54 = vpop.f32.mrb[45].mxu0  ;;  %v1525_v55 = vpop.f32.mrb[45].mxu1  ;;  %v1666_v51 = vld [vmem:[%s3265_s5] sm:$0xff] }
 0x868   :  { %v1531_v57 = vadd.f32 %v1484_v54, %v3315_v56  ;;  %v1533_v59 = vadd.f32 %v1525_v55, %v3316_v58  ;;  %v1486_v60 = vpop.f32.mrb[46].mxu0  ;;  %v1527_v61 = vpop.f32.mrb[46].mxu1 }
 0x869   :  { %v1534_v63 = vadd.f32 %v1530_v33, %v2810_v44  ;;  %v1487_v1 = vpop.f32.mrb[47].mxu0  ;;  %v1528_v2 = vpop.f32.mrb[47].mxu1  ;;  %v1536_v26 = vadd.f32 %v1532_v52, %v2827_v9  ;;  %v1667_v52 = vld [vmem:[%s3265_s5 + $0x8] sm:$0xff] }
 0x86a   :  { %v1535_v3 = vadd.f32 %v1531_v57, %v2814_v0  ;;  %v1537_v17 = vadd.f32 %v1533_v59, %v2821_v6  ;;  %v2142_v54 = vpack.c.bf16 %v1667_v52, %v1666_v51 }
 0x86b   :  { %v2051_v4 = vmul.f32 -1.442695, %v1534_v63 }
 0x86c   :  { %v2052_v5 = vmul.f32 -1.442695, %v1535_v3  ;;  %v2053_v36 = vmul.f32 -1.442695, %v1537_v17  ;;  %2143 = vmatpush3.bf16.msra.mxu1 %v2142_v54 }
 0x86d   :  { %2368 = vpow2.f32 %v2051_v4 }
 0x86e   :  { %2370 = vpow2.f32 %v2052_v5 }
 0x86f   :  { %2372 = vpow2.f32 %v2053_v36 }
 0x870   :  { %2374 = vtanh.f32 %v1536_v26 }
 0x877   :  { %v2369_v34 = vpop.eup %2368 }
 0x878   :  { %v2371_v11 = vpop.eup %2370  ;;  %v1541_v27 = vadd.f32 1.0, %v2369_v34 }
 0x879   :  { %v1547_v24 = vadd.f32 1.0, %v2371_v11  ;;  %v2373_v44 = vpop.eup %2372 }
 0x87a   :  { %2376 = vrcp.f32 %v1541_v27  ;;  %v2375_v29 = vpop.eup %2374  ;;  %v1554_v18 = vadd.f32 1.0, %v2373_v44 }
 0x87b   :  { %2378 = vrcp.f32 %v1547_v24 }
 0x87c   :  { %2380 = vrcp.f32 %v1554_v18 }
 0x884   :  { %v2377_v0 = vpop.eup %2376 }
 0x885   :  { %v2379_v16 = vpop.eup %2378  ;;  %v1558_v32 = vmul.f32 %v2377_v0, %v2375_v29 }
 0x886   :  { %v1557_v14 = vmul.f32 %v2379_v16, %v3117_v12  ;;  %v2381_v9 = vpop.eup %2380  ;;  %v1578_v12 = vld [vmem:[%s3264_s4 + $0x50] sm:$0xff] }
 0x887   :  { %v2133_v37 = vpack.c.bf16 %v1579_v13, %v1578_v12 }
 0x888   :  { %v1559_v6 = vadd.f32 %v1558_v32, %v1557_v14 }
 0x889   :  { %2134 = vmatpush3.bf16.msra.mxu0 %v2133_v37 }
 0x88a   :  { %2382 = vtanh.f32 %v1559_v6  ;;  %2135 = vmatprep.subr.bf16.mxu0 %v2515_v39 }
 0x88d   :  { %2137 = vmatpush3.bf16.msra.mxu0 %v2136_v22 }
 0x88e   :  { %2138 = vmatprep.subr.bf16.mxu0 %v2515_v39 }
 0x891   :  { %2140 = vmatpush3.bf16.msra.mxu0 %v2139_v10  ;;  %v1783_v10 = vsub.s32 4, %v2785_v31 }
 0x894   :  { %v2383_v28 = vpop.eup %2382 }
 0x895   :  { %v1561_v62 = vmul.f32 %v2383_v28, %v2381_v9 }
 0x897   :  { %v1562_v30 = vmul.f32 %v1561_v62, %v1561_v62 }
 0x899   :  { %1563 = vadd.xlane.f32.xlu0 %v1562_v30 }
 0x926   :  { %v1564_v41 = vpop.xlane.xlu0 %1563 }
 0x927   :  { %v1565_v42 = vmax.f32 %v1564_v41, 1e-24 }
 0x929   :  { %2384 = vrsqrt.f32 %v1565_v42 }
 0x933   :  { %v2385_v43 = vpop.eup %2384 }
 0x934   :  { %v1567_v45 = vmul.f32 %v2385_v43, %v1561_v62  ;;  %v1797_v43 = vsub.s32 6, %v2785_v31 }
 0x936   :  { %2108 = vmatmul.mubr.f32.vlgmr.msra.gmra.mrb[48].mxu0 %v1567_v45 }
 0xa09   :  { %v1650_v46 = vpop.f32.mrb[48].mxu0 }
 0xa0a   :  { %v2109_v47 = vpop.f32.mrb[49].mxu0  ;;  %v1655_v48 = vsel %vm1654_vm1, %v1650_v46, -inf }
 0xa0b   :  { %1656 = vmax.xlane.f32.xlu0 %v1655_v48  ;;  %v1804_v48 = vsub.s32 7, %v2785_v31 }
 0xa98   :  { %v1657_v49 = vpop.xlane.xlu0 %1656 }
 0xa99   :  { %v1658_v50 = vsub.f32 %v1650_v46, %v1657_v49 }
 0xa9b   :  { %v1659_v20 = vmul.f32 1.442695, %v1658_v50 }
 0xa9d   :  { %2386 = vpow2.f32 %v1659_v20 }
 0xaa7   :  { %v2387_v33 = vpop.eup %2386 }
 0xaa8   :  { %v1661_v39 = vsel %vm1654_vm1, %v2387_v33, 0.0 }
 0xaa9   :  { %1662 = vadd.xlane.f32.xlu1 %v1661_v39 }
 0xb36   :  { %v1663_v55 = vpop.xlane.xlu1 %1662 }
 0xb37   :  { %2388 = vrcp.f32 %v1663_v55 }
 0xb41   :  { %v2389_v56 = vpop.eup %2388 }
 0xb42   :  { %v1665_v57 = vmul.f32 %v2389_v56, %v2387_v33 }
 0xb44   :  { %2115 = vmatmul.mubr.msk.f32.vlgmr.msra.gmra.mrb[48].mxu1 %vm1654_vm1, %v1665_v57  ;;  %v1900_v58 = vsel %vm1899_vm2, %v1665_v57, 3e+38  ;;  %v1908_v59 = vsel %vm1899_vm2, %v1665_v57, -3e+38 }
 0xb45   :  { %v1901_v60 = vsel %vm1654_vm1, %v1900_v58, inf  ;;  %v1909_v61 = vsel %vm1654_vm1, %v1908_v59, -inf }
 0xb46   :  { %v1902_v63 = vrot.slane %v1901_v60, 4  ;;  %v1910_v1 = vrot.slane %v1909_v61, 4 }
 0xb48   :  { %v1903_v2 = vmin.f32 %v1901_v60, %v1902_v63  ;;  %v1911_v3 = vmax.f32 %v1909_v61, %v1910_v1 }
 0xb4a   :  { %v1904_v4 = vrot.slane %v1903_v2, 2  ;;  %v1912_v5 = vrot.slane %v1911_v3, 2 }
 0xb4c   :  { %v1905_v17 = vmin.f32 %v1903_v2, %v1904_v4  ;;  %v1913_v36 = vmax.f32 %v1911_v3, %v1912_v5 }
 0xb4e   :  { %v1906_v26 = vrot.slane %v1905_v17, 1  ;;  %v1914_v34 = vrot.slane %v1913_v36, 1 }
 0xb50   :  { %v1907_v11 = vmin.f32 %v1905_v17, %v1906_v26  ;;  %v1915_v27 = vmax.f32 %v1913_v36, %v1914_v34 }
 0xb52   :  { %v1916_v24 = vsub.f32 %v1907_v11, %v1915_v27 }
 0xb54   :  { %v1917_v44 = vadd.f32 1.0, %v1916_v24 }
 0xb56   :  { %v1918_v32 = vmax.f32 %v1917_v44, 0.0 }
 0xb58   :  { %v1920_v18 = vsel %vm1919_vm4, %v1918_v32, 0.0 }
 0xc17   :  { %v1737_v29 = vpop.f32.mrb[48].mxu1 }
 0xc18   :  { %v2116_v0 = vpop.f32.mrb[49].mxu1  ;;  %v1742_v16 = vsel %vm1741_vm3, %v1737_v29, -inf }
 0xc19   :  { %1743 = vmax.xlane.f32.xlu1 %v1742_v16 }
 0xc1d   :  { %1921 = vadd.xlane.f32.xlu1 %v1920_v18 }
 0xca6   :  { %v1744_v14 = vpop.xlane.xlu1 %1743 }
 0xca7   :  { %v1745_v6 = vsub.f32 %v1737_v29, %v1744_v14 }
 0xca9   :  { %v1746_v9 = vmul.f32 1.442695, %v1745_v6 }
 0xcaa   :  { %v1922_v28 = vpop.xlane.xlu1 %1921 }
 0xcab   :  { %2390 = vpow2.f32 %v1746_v9  ;;  %v1923_v62 = vrot.slane %v1922_v28, 4 }
 0xcad   :  { %v1924_v30 = vadd.f32 %v1923_v62, %v1922_v28 }
 0xcaf   :  { %v1925_v53 = vrot.slane %v1924_v30, 2 }
 0xcb1   :  { %v1926_v8 = vadd.f32 %v1925_v53, %v1924_v30 }
 0xcb3   :  { %v1927_v19 = vrot.slane %v1926_v8, 1 }
 0xcb5   :  { %v2391_v12 = vpop.eup %2390  ;;  %v1928_v13 = vadd.f32 %v1927_v19, %v1926_v8 }
 0xcb6   :  { %v1748_v25 = vsel %vm1741_vm3, %v2391_v12, 0.0 }
 0xcb7   :  { %1749 = vadd.xlane.f32.xlu0 %v1748_v25  ;;  %2144 = vpush %v1928_v13 }
 0xce8   :  { %s2145_s5 = spop %2144 }
 0xce9   :  { %s1930_s24 = smul.f32 0.0625, %s2145_s5 }
 0xceb   :  { %1932 = sst [smem:[#allocation9]] %s1930_s24 }
 0xd44   :  { %v1750_v37 = vpop.xlane.xlu0 %1749 }
 0xd45   :  { %2392 = vrcp.f32 %v1750_v37 }
 0xd4f   :  { %v2393_v38 = vpop.eup %2392 }
 0xd50   :  { %v1752_v21 = vmul.f32 %v2393_v38, %v2391_v12 }
 0xd52   :  { %v1763_v22 = vrot.slane %v1752_v21, %v715_v35  ;;  %v1756_v40 = vrot.slane %v1752_v21, %v3317_v15  ;;  %v1770_v41 = vrot.slane %v1752_v21, %v719_v7  ;;  %v1784_v42 = vrot.slane %v1752_v21, %v1783_v10 }
 0xd53   :  { %v1777_v45 = vrot.slane %v1752_v21, %v723_v23  ;;  %v1798_v46 = vrot.slane %v1752_v21, %v1797_v43  ;;  %v1790_v35 = vsub.s32 5, %v2785_v31  ;;  %v1805_v49 = vrot.slane %v1752_v21, %v1804_v48 }
 0xd54   :  { %1765 = vbcast.lane.b32.xlu1 %v1763_v22, 256  ;;  %1758 = vbcast.lane.b32.xlu0 %v1756_v40, 256 }
 0xd55   :  { %v1791_v47 = vrot.slane %v1752_v21, %v1790_v35 }
 0xd58   :  { %1772 = vbcast.lane.b32.xlu1 %v1770_v41, 256  ;;  %1786 = vbcast.lane.b32.xlu0 %v1784_v42, 256 }
 0xd5c   :  { %1779 = vbcast.lane.b32.xlu1 %v1777_v45, 256  ;;  %1800 = vbcast.lane.b32.xlu0 %v1798_v46, 256 }
 0xd60   :  { %1793 = vbcast.lane.b32.xlu1 %v1791_v47, 256 }
 0xd64   :  { %1807 = vbcast.lane.b32.xlu1 %v1805_v49, 256 }
 0xd65   :  { %2479 = shalt.err (!%p2476_p4)
}
 0xd66   :  { %s2518_s30 = smov [#allocation9]   ;;  %v1809_v23 = vld [vmem:[%s3266_s6] sm:$0xff]  ;;  %v1810_v31 = vld [vmem:[%s3266_s6 + $0x8] sm:$0xff]  ;;  %v1811_v51 = vld [vmem:[%s3266_s6 + $0x10] sm:$0xff]  ;;  %vm1881_vm5 = vcmask 1041409   ;;  %vm1883_vm6 = vcmask 1042434  }
 0xd67   :  { %1950 = dma.smem_to_hbm %s2518_s30, 16, %s3268_s8, [#allocation5]   ;;  %v1813_v39 = vld [vmem:[%s3266_s6 + $0x20] sm:$0xff]  ;;  %v1815_v3 = vld [vmem:[%s3266_s6 + $0x30] sm:$0xff]  ;;  %v1812_v4 = vld [vmem:[%s3266_s6 + $0x18] sm:$0xff]  ;;  %vm1885_vm7 = vcmask 1043459  }
 0xd68   :  { %v1814_v29 = vld [vmem:[%s3266_s6 + $0x28] sm:$0xff]  ;;  %v1816_v53 = vld [vmem:[%s3266_s6 + $0x38] sm:$0xff]  ;;  %vm1887_vm8 = vcmask 1044484   ;;  %vm1889_vm9 = vcmask 1045509   ;;  %vm1891_vm10 = vcmask 1046534   ;;  %s2519_s6 = smov [#allocation8]  }
 0xd69   :  { %s1939_s23 = sshll.u32 %s2519_s6, 4  ;;  %vm1893_vm11 = vcmask 1047559   ;;  %s1940_s23 = int_to_ptr.vmem [resolvable:$true] %s1939_s23 }
 0xd6a   :  { %s2480_s5 = scalar_lea.vmem %s1940_s23, 128  ;;  %p2485_p6 = scmp.lt.s32.totalorder %s1940_s23, %s1940_s23 }
 0xd6b   :  { %p2481_p5 = scmp.ne.s32.totalorder %s1940_s23, %s2480_s5  ;;  %p2486_p7 = scmp.lt.s32.totalorder %s2480_s5, %s2480_s5 }
 0xd6d   :  { %p2487_p8 = por %p2486_p7, %p2485_p6 }
 0xd6f   :  { %p2488_p9 = pnand %p2487_p8, %p2481_p5 }
 0xdc6   :  { %v1759_v7 = vpop.permute.xlu0 %1758  ;;  %v1766_v50 = vpop.permute.xlu1 %1765 }
 0xdc7   :  { %v1817_v20 = vmul.f32 %v1809_v23, %v1759_v7  ;;  %v1818_v33 = vmul.f32 %v1810_v31, %v1766_v50 }
 0xdc9   :  { %v1825_v52 = vrot.slane %v1817_v20, 4  ;;  %v1831_v54 = vrot.slane %v1818_v33, 4 }
 0xdca   :  { %v1787_v55 = vpop.permute.xlu0 %1786  ;;  %v1773_v56 = vpop.permute.xlu1 %1772 }
 0xdcb   :  { %v1826_v57 = vadd.f32 %v1825_v52, %v1817_v20  ;;  %v1832_v58 = vadd.f32 %v1831_v54, %v1818_v33  ;;  %v1821_v59 = vmul.f32 %v1813_v39, %v1787_v55  ;;  %v1819_v60 = vmul.f32 %v1811_v51, %v1773_v56 }
 0xdcd   :  { %v1827_v61 = vrot.slane %v1826_v57, 2  ;;  %v1833_v63 = vrot.slane %v1832_v58, 2  ;;  %v1849_v1 = vrot.slane %v1821_v59, 4  ;;  %v1837_v2 = vrot.slane %v1819_v60, 4 }
 0xdce   :  { %v1801_v5 = vpop.permute.xlu0 %1800  ;;  %v1780_v17 = vpop.permute.xlu1 %1779 }
 0xdcf   :  { %v1828_v36 = vadd.f32 %v1827_v61, %v1826_v57  ;;  %v1850_v26 = vadd.f32 %v1849_v1, %v1821_v59  ;;  %v1838_v34 = vadd.f32 %v1837_v2, %v1819_v60  ;;  %v1834_v11 = vadd.f32 %v1833_v63, %v1832_v58 }
 0xdd0   :  { %v1823_v27 = vmul.f32 %v1815_v3, %v1801_v5  ;;  %v1820_v24 = vmul.f32 %v1812_v4, %v1780_v17 }
 0xdd1   :  { %v1839_v44 = vrot.slane %v1838_v34, 2  ;;  %v1829_v18 = vrot.slane %v1828_v36, 1  ;;  %v1851_v14 = vrot.slane %v1850_v26, 2  ;;  %v1835_v9 = vrot.slane %v1834_v11, 1 }
 0xdd2   :  { %v1861_v0 = vrot.slane %v1823_v27, 4  ;;  %v1843_v16 = vrot.slane %v1820_v24, 4  ;;  %v1794_v32 = vpop.permute.xlu1 %1793 }
 0xdd3   :  { %v1840_v6 = vadd.f32 %v1839_v44, %v1838_v34  ;;  %v1822_v30 = vmul.f32 %v1814_v29, %v1794_v32  ;;  %v1852_v37 = vadd.f32 %v1851_v14, %v1850_v26  ;;  %v1830_v21 = vadd.f32 %v1829_v18, %v1828_v36 }
 0xdd4   :  { %v1862_v28 = vadd.f32 %v1861_v0, %v1823_v27  ;;  %v1844_v62 = vadd.f32 %v1843_v16, %v1820_v24  ;;  %v1836_v22 = vadd.f32 %v1835_v9, %v1834_v11 }
 0xdd5   :  { %v1841_v8 = vrot.slane %v1840_v6, 1  ;;  %v1855_v13 = vrot.slane %v1822_v30, 4  ;;  %v1853_v46 = vrot.slane %v1852_v37, 1 }
 0xdd6   :  { %v1863_v19 = vrot.slane %v1862_v28, 2  ;;  %v1845_v12 = vrot.slane %v1844_v62, 2  ;;  %v1808_v25 = vpop.permute.xlu1 %1807  ;;  %v1882_v47 = vsel %vm1881_vm5, %v1836_v22, %v1830_v21 }
 0xdd7   :  { %v1824_v38 = vmul.f32 %v1816_v53, %v1808_v25  ;;  %v1856_v40 = vadd.f32 %v1855_v13, %v1822_v30  ;;  %v1842_v10 = vadd.f32 %v1841_v8, %v1840_v6  ;;  %v1854_v33 = vadd.f32 %v1853_v46, %v1852_v37 }
 0xdd8   :  { %v1846_v15 = vadd.f32 %v1845_v12, %v1844_v62  ;;  %v1864_v42 = vadd.f32 %v1863_v19, %v1862_v28 }
 0xdd9   :  { %v1867_v41 = vrot.slane %v1824_v38, 4  ;;  %v1857_v45 = vrot.slane %v1856_v40, 2  ;;  %v1884_v23 = vsel %vm1883_vm6, %v1842_v10, %v1882_v47 }
 0xdda   :  { %v1847_v43 = vrot.slane %v1846_v15, 1  ;;  %v1865_v7 = vrot.slane %v1864_v42, 1 }
 0xddb   :  { %v1868_v35 = vadd.f32 %v1867_v41, %v1824_v38  ;;  %v1858_v49 = vadd.f32 %v1857_v45, %v1856_v40 }
 0xddc   :  { %v1848_v48 = vadd.f32 %v1847_v43, %v1846_v15  ;;  %v1866_v55 = vadd.f32 %v1865_v7, %v1864_v42 }
 0xddd   :  { %v1869_v31 = vrot.slane %v1868_v35, 2  ;;  %v1859_v20 = vrot.slane %v1858_v49, 1 }
 0xdde   :  { %v1886_v50 = vsel %vm1885_vm7, %v1848_v48, %v1884_v23 }
 0xddf   :  { %v1870_v39 = vadd.f32 %v1869_v31, %v1868_v35  ;;  %v1860_v51 = vadd.f32 %v1859_v20, %v1858_v49  ;;  %v1888_v54 = vsel %vm1887_vm8, %v1854_v33, %v1886_v50 }
 0xde1   :  { %v1871_v52 = vrot.slane %v1870_v39, 1  ;;  %v1890_v56 = vsel %vm1889_vm9, %v1860_v51, %v1888_v54 }
 0xde2   :  { %v1892_v58 = vsel %vm1891_vm10, %v1866_v55, %v1890_v56 }
 0xde3   :  { %v1872_v57 = vadd.f32 %v1871_v52, %v1870_v39 }
 0xde5   :  { %v1894_v59 = vsel %vm1893_vm11, %v1872_v57, %v1892_v58 }
 0xde6   :  { %1896 = vst [vmem:[#allocation8] sm:$0xff] %v1894_v59 }
 0xde7   :  { %2491 = shalt.err (!%p2488_p9)
}
 0xde8   :  { %s2492_s26 = scalar_lea.hbm %s3267_s7, 128 }
 0xde9   :  { %p2493_p10 = scmp.ne.s32.totalorder %s3267_s7, %s2492_s26  ;;  %p2496_p11 = scmp.lt.u32.totalorder %s2492_s26, %s3267_s7 }
 0xdeb   :  { %p2498_p12 = pnand %p2496_p11, %p2493_p10 }
 0xded   :  { %2501 = shalt.err (!%p2498_p12)
}
 0xdee   :  { %1942 = dma.vmem_to_hbm [thread:$0]  %s1940_s23, 128, %s3267_s7, [#allocation4]  }
 0xdef   :  { %2506 = dma.done.wait [#allocation4], 128  }
 0xdf0   :  { %2507 = vsyncadd [#allocation4], 4294967168 }
 0xdf1   :  { %2508 = dma.done.wait [#allocation5], 16  }
 0xdf2   :  { %2509 = vsyncadd [#allocation5], 4294967280 }
 0xdf3   :  { %1957 = sfence }
 0xdf4   :  { %1958 = vsyncpa [#allocation3], 1 }
 0xdf5   :  { %1959 = vsyncpa [#allocation7], 1 }
 0xdf6   :  { %1960 = vsyncpa [#allocation4], 1 }
 0xdf7   :  { %1961 = vsyncpa [#allocation5], 1 }

</bundles_post_ra>
